<compile_context>
chip_gen: v6e
topology: v6e:2x2x1
jax: 0.10.0
libtpu: 0.0.40
codegen_flags: <defaults>
</compile_context>

<pallas_src>
import functools

import jax
import jax.numpy as jnp
from jax.experimental import pallas as pl
from jax.experimental.pallas import tpu as pltpu

LN_EPS = 1e-5  # PyTorch nn.LayerNorm default


def _round_up(x, m):
    return (x + m - 1) // m * m


def _layernorm(x, gamma, beta):
    mu = jnp.mean(x, axis=-1, keepdims=True)
    var = jnp.mean((x - mu) ** 2, axis=-1, keepdims=True)  # biased var (PyTorch LN)
    xn = (x - mu) * jax.lax.rsqrt(var + LN_EPS)
    return xn * gamma + beta


def ffb_kernel(x_ref, g1_ref, be1_ref, w1_ref, b1_ref, w2_ref, b2_ref,
               g2_ref, be2_ref, o_ref, *, matmul_dtype):
    x = x_ref[...].astype(jnp.float32)

    # pre_norm (f32 statistics)
    h = _layernorm(x, g1_ref[...].astype(jnp.float32), be1_ref[...].astype(jnp.float32))

    # feedforward: Linear -> Sigmoid -> (Dropout p=0) -> Linear -> (Dropout p=0)
    h_mm = h if matmul_dtype is None else h.astype(matmul_dtype)
    z = jnp.dot(h_mm, w1_ref[...], preferred_element_type=jnp.float32)
    z = jax.nn.sigmoid(z + b1_ref[...].astype(jnp.float32))
    z_mm = z if matmul_dtype is None else z.astype(matmul_dtype)
    y = jnp.dot(z_mm, w2_ref[...], preferred_element_type=jnp.float32)
    y = y + b2_ref[...].astype(jnp.float32)

    # residual with the pre-normed activation (matches `x = pre_norm(x); x = ff(x) + x`)
    r = y + h

    # post_norm
    out = _layernorm(r, g2_ref[...].astype(jnp.float32), be2_ref[...].astype(jnp.float32))
    o_ref[...] = out.astype(o_ref.dtype)


def feedforward_block(x, params, *, tile_m=512, matmul_dtype=None):
    """x: (B, S, D) float32. Returns (B, S, D)."""
    B, S, D = x.shape
    M = B * S
    H = params["w1"].shape[1]

    # Effective row tile: as large as requested (MXU / per-grid-step-overhead friendly),
    # but no larger than the padded token count; always a multiple of 8 sublanes.
    tm = max(8, min(_round_up(tile_m, 8), _round_up(M, 8)))
    Mp = _round_up(M, tm)

    x2 = x.reshape(M, D)
    if Mp != M:
        x2 = jnp.pad(x2, ((0, Mp - M), (0, 0)))  # padded rows are sliced off below

    w1 = params["w1"]
    w2 = params["w2"]
    if matmul_dtype is not None:
        w1 = w1.astype(matmul_dtype)
        w2 = w2.astype(matmul_dtype)
    w_itemsize = jnp.dtype(w1.dtype).itemsize

    grid = (Mp // tm,)

    # --- VMEM budget: 2x double-buffered activation tiles + resident weights +
    #     f32 intermediates, with headroom; clamped so it is valid on every gen.
    tile_bytes = 2 * 2 * tm * D * x.dtype.itemsize          # x-in + out, double buffered
    weight_bytes = (D * H + H * D) * w_itemsize              # single-buffered weights
    small_bytes = (2 * H + 6 * D) * 4 * 2                    # biases + LN params
    compute_bytes = 4 * tm * H * 4                           # z & friends in f32
    vmem_bytes = int(1.5 * (tile_bytes + weight_bytes + small_bytes + compute_bytes))
    vmem_bytes = min(max(vmem_bytes + (4 << 20), 32 << 20), 64 << 20)

    def run(const_pm):
        def const2d(r, c):
            # Constant index_map -> no second DMA buffer needed for these blocks.
            if const_pm is None:
                return pl.BlockSpec((r, c), lambda i: (0, 0))
            return pl.BlockSpec((r, c), lambda i: (0, 0), pipeline_mode=const_pm)

        kernel = functools.partial(ffb_kernel, matmul_dtype=matmul_dtype)
        return pl.pallas_call(
            kernel,
            out_shape=jax.ShapeDtypeStruct((Mp, D), x.dtype),
            grid_spec=pltpu.PrefetchScalarGridSpec(
                num_scalar_prefetch=0,
                grid=grid,
                in_specs=[
                    pl.BlockSpec((tm, D), lambda i: (i, 0)),  # x tile (double-buffered)
                    const2d(1, D),   # ln1 gamma
                    const2d(1, D),   # ln1 beta
                    const2d(D, H),   # W1
                    const2d(1, H),   # b1
                    const2d(H, D),   # W2
                    const2d(1, D),   # b2
                    const2d(1, D),   # ln2 gamma
                    const2d(1, D),   # ln2 beta
                ],
                out_specs=pl.BlockSpec((tm, D), lambda i: (i, 0)),
            ),
            compiler_params=pltpu.CompilerParams(
                dimension_semantics=("parallel",),
                vmem_limit_bytes=vmem_bytes),
        )(x2,
          params["ln1_g"], params["ln1_b"],
          w1, params["b1"],
          w2, params["b2"],
          params["ln2_g"], params["ln2_b"])

    try:
        out = run(pl.Buffered(1))
    except Exception:
        # Fallback: default (double) buffering for the constant blocks.
        out = run(None)

    return out[:M].reshape(B, S, D)


def init_params(key, dim, mult=4):
    hidden = dim * mult
    k1, k2, k3, k4 = jax.random.split(key, 4)
    lim1 = 1.0 / jnp.sqrt(dim)
    lim2 = 1.0 / jnp.sqrt(hidden)
    return {
        "ln1_g": jnp.ones((1, dim), jnp.float32),
        "ln1_b": jnp.zeros((1, dim), jnp.float32),
        "w1": jax.random.uniform(k1, (dim, hidden), jnp.float32, -lim1, lim1),
        "b1": jax.random.uniform(k2, (1, hidden), jnp.float32, -lim1, lim1),
        "w2": jax.random.uniform(k3, (hidden, dim), jnp.float32, -lim2, lim2),
        "b2": jax.random.uniform(k4, (1, dim), jnp.float32, -lim2, lim2),
        "ln2_g": jnp.ones((1, dim), jnp.float32),
        "ln2_b": jnp.zeros((1, dim), jnp.float32),
    }


def reference(x, p):
    def ln(v, g, b):
        mu = jnp.mean(v, axis=-1, keepdims=True)
        var = jnp.mean((v - mu) ** 2, axis=-1, keepdims=True)
        return (v - mu) * jax.lax.rsqrt(var + LN_EPS) * g + b
    h = ln(x, p["ln1_g"][0], p["ln1_b"][0])
    z = jax.nn.sigmoid(h @ p["w1"] + p["b1"][0])
    y = z @ p["w2"] + p["b2"][0]
    r = y + h
    return ln(r, p["ln2_g"][0], p["ln2_b"][0])


if __name__ == "__main__":
    key = jax.random.PRNGKey(0)
    kx, kp, kx2 = jax.random.split(key, 3)

    # Small but lane-dense feature dim (multiple of 128) -> unmasked output stores.
    B, S, D, MULT = 2, 8, 128, 4
    x = jax.random.normal(kx, (B, S, D), jnp.float32)
    params = init_params(kp, D, MULT)

    # 1) f32 path (matches PyTorch numerics).
    out = jax.block_until_ready(feedforward_block(x, params))
    ref = reference(x, params)
    assert out.shape == (B, S, D)
    assert jnp.allclose(out, ref, atol=1e-4, rtol=1e-4)

    # 2) Ragged token count (M = 21, not a multiple of the tile) exercises padding path.
    x_r = jax.random.normal(kx2, (3, 7, D), jnp.float32)
    out_r = jax.block_until_ready(feedforward_block(x_r, params, tile_m=256))
    ref_r = reference(x_r, params)
    assert out_r.shape == (3, 7, D)
    assert jnp.allclose(out_r, ref_r, atol=1e-4, rtol=1e-4)

    # 3) bf16-matmul perf mode (v6e/v7x): f32 LN/sigmoid/accumulate, bf16 MXU inputs.
    out_bf = jax.block_until_ready(
        feedforward_block(x, params, matmul_dtype=jnp.bfloat16))
    assert jnp.allclose(out_bf, ref, atol=5e-2, rtol=5e-2)

    print("KERNEL_OK")
</pallas_src>

<mosaic_0001>
module attributes {stable_mosaic.version = 11 : i64} {
  func.func @ffb_kernel(%arg0: i32, %arg1: memref<16x128xf32, #tpu.memory_space<vmem>>, %arg2: memref<1x128xf32, #tpu.memory_space<vmem>>, %arg3: memref<1x128xf32, #tpu.memory_space<vmem>>, %arg4: memref<128x512xf32, #tpu.memory_space<vmem>>, %arg5: memref<1x512xf32, #tpu.memory_space<vmem>>, %arg6: memref<512x128xf32, #tpu.memory_space<vmem>>, %arg7: memref<1x128xf32, #tpu.memory_space<vmem>>, %arg8: memref<1x128xf32, #tpu.memory_space<vmem>>, %arg9: memref<1x128xf32, #tpu.memory_space<vmem>>, %arg10: memref<16x128xf32, #tpu.memory_space<vmem>>) attributes {dimension_semantics = [#tpu.dimension_semantics<parallel>], iteration_bounds = array<i64: 1>, scalar_prefetch = 0 : i64, scratch_operands = 0 : i64, tpu.core_type = #tpu.core_type<tc>, window_params = [{transform_indices = @transform_0, window_bounds = array<i64: 16, 128>}, {pipeline_mode = #tpu.pipeline_mode<synchronous>, transform_indices = @transform_1, window_bounds = array<i64: 1, 128>}, {pipeline_mode = #tpu.pipeline_mode<synchronous>, transform_indices = @transform_2, window_bounds = array<i64: 1, 128>}, {pipeline_mode = #tpu.pipeline_mode<synchronous>, transform_indices = @transform_3, window_bounds = array<i64: 128, 512>}, {pipeline_mode = #tpu.pipeline_mode<synchronous>, transform_indices = @transform_4, window_bounds = array<i64: 1, 512>}, {pipeline_mode = #tpu.pipeline_mode<synchronous>, transform_indices = @transform_5, window_bounds = array<i64: 512, 128>}, {pipeline_mode = #tpu.pipeline_mode<synchronous>, transform_indices = @transform_6, window_bounds = array<i64: 1, 128>}, {pipeline_mode = #tpu.pipeline_mode<synchronous>, transform_indices = @transform_7, window_bounds = array<i64: 1, 128>}, {pipeline_mode = #tpu.pipeline_mode<synchronous>, transform_indices = @transform_8, window_bounds = array<i64: 1, 128>}, {transform_indices = @transform_9, window_bounds = array<i64: 16, 128>}]} {
    %c0 = arith.constant 0 : index
    %c0_0 = arith.constant 0 : index
    %0 = vector.load %arg1[%c0, %c0_0] : memref<16x128xf32, #tpu.memory_space<vmem>>, vector<16x128xf32>
    %c0_1 = arith.constant 0 : index
    %c0_2 = arith.constant 0 : index
    %1 = vector.load %arg2[%c0_1, %c0_2] : memref<1x128xf32, #tpu.memory_space<vmem>>, vector<1x128xf32>
    %c0_3 = arith.constant 0 : index
    %c0_4 = arith.constant 0 : index
    %2 = vector.load %arg3[%c0_3, %c0_4] : memref<1x128xf32, #tpu.memory_space<vmem>>, vector<1x128xf32>
    %cst = arith.constant dense<0.000000e+00> : vector<16xf32>
    %3 = vector.multi_reduction <add>, %0, %cst [1] : vector<16x128xf32> to vector<16xf32>
    %4 = vector.shape_cast %3 : vector<16xf32> to vector<16x1xf32>
    %cst_5 = arith.constant 1.280000e+02 : f32
    %5 = vector.broadcast %cst_5 : f32 to vector<16x1xf32>
    %6 = arith.divf %4, %5 : vector<16x1xf32>
    %7 = vector.broadcast %6 : vector<16x1xf32> to vector<16x128xf32>
    %8 = arith.subf %0, %7 : vector<16x128xf32>
    %9 = arith.mulf %8, %8 : vector<16x128xf32>
    %cst_6 = arith.constant dense<0.000000e+00> : vector<16xf32>
    %10 = vector.multi_reduction <add>, %9, %cst_6 [1] : vector<16x128xf32> to vector<16xf32>
    %11 = vector.shape_cast %10 : vector<16xf32> to vector<16x1xf32>
    %cst_7 = arith.constant 1.280000e+02 : f32
    %12 = vector.broadcast %cst_7 : f32 to vector<16x1xf32>
    %13 = arith.divf %11, %12 : vector<16x1xf32>
    %14 = vector.broadcast %6 : vector<16x1xf32> to vector<16x128xf32>
    %15 = arith.subf %0, %14 : vector<16x128xf32>
    %cst_8 = arith.constant 9.99999974E-6 : f32
    %16 = vector.broadcast %cst_8 : f32 to vector<16x1xf32>
    %17 = arith.addf %13, %16 : vector<16x1xf32>
    %18 = math.rsqrt %17 : vector<16x1xf32>
    %19 = vector.broadcast %18 : vector<16x1xf32> to vector<16x128xf32>
    %20 = arith.mulf %15, %19 : vector<16x128xf32>
    %21 = vector.broadcast %1 : vector<1x128xf32> to vector<16x128xf32>
    %22 = arith.mulf %20, %21 : vector<16x128xf32>
    %23 = vector.broadcast %2 : vector<1x128xf32> to vector<16x128xf32>
    %24 = arith.addf %22, %23 : vector<16x128xf32>
    %c0_9 = arith.constant 0 : index
    %c0_10 = arith.constant 0 : index
    %25 = vector.load %arg4[%c0_9, %c0_10] : memref<128x512xf32, #tpu.memory_space<vmem>>, vector<128x512xf32>
    %cst_11 = arith.constant dense<0.000000e+00> : vector<16x512xf32>
    %26 = tpu.matmul %24, %25, %cst_11 {dimension_numbers = #tpu.dot_dimension_numbers<[1], [0], [0], [1], [0, 0, 1, 1], [], []>} : vector<16x128xf32>, vector<128x512xf32>, vector<16x512xf32> -> vector<16x512xf32>
    %c0_12 = arith.constant 0 : index
    %c0_13 = arith.constant 0 : index
    %27 = vector.load %arg5[%c0_12, %c0_13] : memref<1x512xf32, #tpu.memory_space<vmem>>, vector<1x512xf32>
    %28 = vector.broadcast %27 : vector<1x512xf32> to vector<16x512xf32>
    %29 = arith.addf %26, %28 : vector<16x512xf32>
    %30 = arith.negf %29 : vector<16x512xf32>
    %31 = math.exp %30 : vector<16x512xf32>
    %cst_14 = arith.constant 1.000000e+00 : f32
    %32 = vector.broadcast %cst_14 : f32 to vector<16x512xf32>
    %33 = arith.addf %32, %31 : vector<16x512xf32>
    %34 = arith.divf %32, %33 : vector<16x512xf32>
    %c0_15 = arith.constant 0 : index
    %c0_16 = arith.constant 0 : index
    %35 = vector.load %arg6[%c0_15, %c0_16] : memref<512x128xf32, #tpu.memory_space<vmem>>, vector<512x128xf32>
    %cst_17 = arith.constant dense<0.000000e+00> : vector<16x128xf32>
    %36 = tpu.matmul %34, %35, %cst_17 {dimension_numbers = #tpu.dot_dimension_numbers<[1], [0], [0], [1], [0, 0, 1, 1], [], []>} : vector<16x512xf32>, vector<512x128xf32>, vector<16x128xf32> -> vector<16x128xf32>
    %c0_18 = arith.constant 0 : index
    %c0_19 = arith.constant 0 : index
    %37 = vector.load %arg7[%c0_18, %c0_19] : memref<1x128xf32, #tpu.memory_space<vmem>>, vector<1x128xf32>
    %38 = vector.broadcast %37 : vector<1x128xf32> to vector<16x128xf32>
    %39 = arith.addf %36, %38 : vector<16x128xf32>
    %40 = arith.addf %39, %24 : vector<16x128xf32>
    %c0_20 = arith.constant 0 : index
    %c0_21 = arith.constant 0 : index
    %41 = vector.load %arg8[%c0_20, %c0_21] : memref<1x128xf32, #tpu.memory_space<vmem>>, vector<1x128xf32>
    %c0_22 = arith.constant 0 : index
    %c0_23 = arith.constant 0 : index
    %42 = vector.load %arg9[%c0_22, %c0_23] : memref<1x128xf32, #tpu.memory_space<vmem>>, vector<1x128xf32>
    %cst_24 = arith.constant dense<0.000000e+00> : vector<16xf32>
    %43 = vector.multi_reduction <add>, %40, %cst_24 [1] : vector<16x128xf32> to vector<16xf32>
    %44 = vector.shape_cast %43 : vector<16xf32> to vector<16x1xf32>
    %cst_25 = arith.constant 1.280000e+02 : f32
    %45 = vector.broadcast %cst_25 : f32 to vector<16x1xf32>
    %46 = arith.divf %44, %45 : vector<16x1xf32>
    %47 = vector.broadcast %46 : vector<16x1xf32> to vector<16x128xf32>
    %48 = arith.subf %40, %47 : vector<16x128xf32>
    %49 = arith.mulf %48, %48 : vector<16x128xf32>
    %cst_26 = arith.constant dense<0.000000e+00> : vector<16xf32>
    %50 = vector.multi_reduction <add>, %49, %cst_26 [1] : vector<16x128xf32> to vector<16xf32>
    %51 = vector.shape_cast %50 : vector<16xf32> to vector<16x1xf32>
    %cst_27 = arith.constant 1.280000e+02 : f32
    %52 = vector.broadcast %cst_27 : f32 to vector<16x1xf32>
    %53 = arith.divf %51, %52 : vector<16x1xf32>
    %54 = vector.broadcast %46 : vector<16x1xf32> to vector<16x128xf32>
    %55 = arith.subf %40, %54 : vector<16x128xf32>
    %cst_28 = arith.constant 9.99999974E-6 : f32
    %56 = vector.broadcast %cst_28 : f32 to vector<16x1xf32>
    %57 = arith.addf %53, %56 : vector<16x1xf32>
    %58 = math.rsqrt %57 : vector<16x1xf32>
    %59 = vector.broadcast %58 : vector<16x1xf32> to vector<16x128xf32>
    %60 = arith.mulf %55, %59 : vector<16x128xf32>
    %61 = vector.broadcast %41 : vector<1x128xf32> to vector<16x128xf32>
    %62 = arith.mulf %60, %61 : vector<16x128xf32>
    %63 = vector.broadcast %42 : vector<1x128xf32> to vector<16x128xf32>
    %64 = arith.addf %62, %63 : vector<16x128xf32>
    %c0_29 = arith.constant 0 : index
    %c0_30 = arith.constant 0 : index
    %65 = vector.load %arg10[%c0_29, %c0_30] : memref<16x128xf32, #tpu.memory_space<vmem>>, vector<16x128xf32>
    tpu.vector_store %arg10[%c0_29, %c0_30], %64 {strides = array<i32>} : memref<16x128xf32, #tpu.memory_space<vmem>>, vector<16x128xf32>,
    return
  }
  func.func @transform_0(%arg0: i32) -> (i32, i32) {
    %c0_i32 = arith.constant 0 : i32
    %c0_i32_0 = arith.constant 0 : i32
    return %arg0, %c0_i32 : i32, i32
  }
  func.func @transform_1(%arg0: i32) -> (i32, i32) {
    %c0_i32 = arith.constant 0 : i32
    %c0_i32_0 = arith.constant 0 : i32
    %c0_i32_1 = arith.constant 0 : i32
    return %c0_i32, %c0_i32_0 : i32, i32
  }
  func.func @transform_2(%arg0: i32) -> (i32, i32) {
    %c0_i32 = arith.constant 0 : i32
    %c0_i32_0 = arith.constant 0 : i32
    %c0_i32_1 = arith.constant 0 : i32
    return %c0_i32, %c0_i32_0 : i32, i32
  }
  func.func @transform_3(%arg0: i32) -> (i32, i32) {
    %c0_i32 = arith.constant 0 : i32
    %c0_i32_0 = arith.constant 0 : i32
    %c0_i32_1 = arith.constant 0 : i32
    return %c0_i32, %c0_i32_0 : i32, i32
  }
  func.func @transform_4(%arg0: i32) -> (i32, i32) {
    %c0_i32 = arith.constant 0 : i32
    %c0_i32_0 = arith.constant 0 : i32
    %c0_i32_1 = arith.constant 0 : i32
    return %c0_i32, %c0_i32_0 : i32, i32
  }
  func.func @transform_5(%arg0: i32) -> (i32, i32) {
    %c0_i32 = arith.constant 0 : i32
    %c0_i32_0 = arith.constant 0 : i32
    %c0_i32_1 = arith.constant 0 : i32
    return %c0_i32, %c0_i32_0 : i32, i32
  }
  func.func @transform_6(%arg0: i32) -> (i32, i32) {
    %c0_i32 = arith.constant 0 : i32
    %c0_i32_0 = arith.constant 0 : i32
    %c0_i32_1 = arith.constant 0 : i32
    return %c0_i32, %c0_i32_0 : i32, i32
  }
  func.func @transform_7(%arg0: i32) -> (i32, i32) {
    %c0_i32 = arith.constant 0 : i32
    %c0_i32_0 = arith.constant 0 : i32
    %c0_i32_1 = arith.constant 0 : i32
    return %c0_i32, %c0_i32_0 : i32, i32
  }
  func.func @transform_8(%arg0: i32) -> (i32, i32) {
    %c0_i32 = arith.constant 0 : i32
    %c0_i32_0 = arith.constant 0 : i32
    %c0_i32_1 = arith.constant 0 : i32
    return %c0_i32, %c0_i32_0 : i32, i32
  }
  func.func @transform_9(%arg0: i32) -> (i32, i32) {
    %c0_i32 = arith.constant 0 : i32
    %c0_i32_0 = arith.constant 0 : i32
    return %arg0, %c0_i32 : i32, i32
  }
}

module attributes {stable_mosaic.version = 11 : i64} {
  func.func @ffb_kernel(%arg0: i32, %arg1: memref<16x128xf32, #tpu.memory_space<vmem>>, %arg2: memref<1x128xf32, #tpu.memory_space<vmem>>, %arg3: memref<1x128xf32, #tpu.memory_space<vmem>>, %arg4: memref<128x512xf32, #tpu.memory_space<vmem>>, %arg5: memref<1x512xf32, #tpu.memory_space<vmem>>, %arg6: memref<512x128xf32, #tpu.memory_space<vmem>>, %arg7: memref<1x128xf32, #tpu.memory_space<vmem>>, %arg8: memref<1x128xf32, #tpu.memory_space<vmem>>, %arg9: memref<1x128xf32, #tpu.memory_space<vmem>>, %arg10: memref<16x128xf32, #tpu.memory_space<vmem>>) attributes {dimension_semantics = [#tpu.dimension_semantics<parallel>], iteration_bounds = array<i64: 1>, scalar_prefetch = 0 : i64, scratch_operands = 0 : i64, tpu.core_type = #tpu.core_type<tc>, window_params = [{transform_indices = @transform_0, window_bounds = array<i64: 16, 128>}, {pipeline_mode = #tpu.pipeline_mode<synchronous>, transform_indices = @transform_1, window_bounds = array<i64: 1, 128>}, {pipeline_mode = #tpu.pipeline_mode<synchronous>, transform_indices = @transform_2, window_bounds = array<i64: 1, 128>}, {pipeline_mode = #tpu.pipeline_mode<synchronous>, transform_indices = @transform_3, window_bounds = array<i64: 128, 512>}, {pipeline_mode = #tpu.pipeline_mode<synchronous>, transform_indices = @transform_4, window_bounds = array<i64: 1, 512>}, {pipeline_mode = #tpu.pipeline_mode<synchronous>, transform_indices = @transform_5, window_bounds = array<i64: 512, 128>}, {pipeline_mode = #tpu.pipeline_mode<synchronous>, transform_indices = @transform_6, window_bounds = array<i64: 1, 128>}, {pipeline_mode = #tpu.pipeline_mode<synchronous>, transform_indices = @transform_7, window_bounds = array<i64: 1, 128>}, {pipeline_mode = #tpu.pipeline_mode<synchronous>, transform_indices = @transform_8, window_bounds = array<i64: 1, 128>}, {transform_indices = @transform_9, window_bounds = array<i64: 16, 128>}]} {
    %c0 = arith.constant 0 : index
    %c0_0 = arith.constant 0 : index
    %0 = vector.load %arg1[%c0, %c0_0] : memref<16x128xf32, #tpu.memory_space<vmem>>, vector<16x128xf32>
    %c0_1 = arith.constant 0 : index
    %c0_2 = arith.constant 0 : index
    %1 = vector.load %arg2[%c0_1, %c0_2] : memref<1x128xf32, #tpu.memory_space<vmem>>, vector<1x128xf32>
    %c0_3 = arith.constant 0 : index
    %c0_4 = arith.constant 0 : index
    %2 = vector.load %arg3[%c0_3, %c0_4] : memref<1x128xf32, #tpu.memory_space<vmem>>, vector<1x128xf32>
    %cst = arith.constant dense<0.000000e+00> : vector<16xf32>
    %3 = vector.multi_reduction <add>, %0, %cst [1] : vector<16x128xf32> to vector<16xf32>
    %4 = vector.shape_cast %3 : vector<16xf32> to vector<16x1xf32>
    %cst_5 = arith.constant 1.280000e+02 : f32
    %5 = vector.broadcast %cst_5 : f32 to vector<16x1xf32>
    %6 = arith.divf %4, %5 : vector<16x1xf32>
    %7 = vector.broadcast %6 : vector<16x1xf32> to vector<16x128xf32>
    %8 = arith.subf %0, %7 : vector<16x128xf32>
    %9 = arith.mulf %8, %8 : vector<16x128xf32>
    %cst_6 = arith.constant dense<0.000000e+00> : vector<16xf32>
    %10 = vector.multi_reduction <add>, %9, %cst_6 [1] : vector<16x128xf32> to vector<16xf32>
    %11 = vector.shape_cast %10 : vector<16xf32> to vector<16x1xf32>
    %cst_7 = arith.constant 1.280000e+02 : f32
    %12 = vector.broadcast %cst_7 : f32 to vector<16x1xf32>
    %13 = arith.divf %11, %12 : vector<16x1xf32>
    %14 = vector.broadcast %6 : vector<16x1xf32> to vector<16x128xf32>
    %15 = arith.subf %0, %14 : vector<16x128xf32>
    %cst_8 = arith.constant 9.99999974E-6 : f32
    %16 = vector.broadcast %cst_8 : f32 to vector<16x1xf32>
    %17 = arith.addf %13, %16 : vector<16x1xf32>
    %18 = math.rsqrt %17 : vector<16x1xf32>
    %19 = vector.broadcast %18 : vector<16x1xf32> to vector<16x128xf32>
    %20 = arith.mulf %15, %19 : vector<16x128xf32>
    %21 = vector.broadcast %1 : vector<1x128xf32> to vector<16x128xf32>
    %22 = arith.mulf %20, %21 : vector<16x128xf32>
    %23 = vector.broadcast %2 : vector<1x128xf32> to vector<16x128xf32>
    %24 = arith.addf %22, %23 : vector<16x128xf32>
    %c0_9 = arith.constant 0 : index
    %c0_10 = arith.constant 0 : index
    %25 = vector.load %arg4[%c0_9, %c0_10] : memref<128x512xf32, #tpu.memory_space<vmem>>, vector<128x512xf32>
    %cst_11 = arith.constant dense<0.000000e+00> : vector<16x512xf32>
    %26 = tpu.matmul %24, %25, %cst_11 {dimension_numbers = #tpu.dot_dimension_numbers<[1], [0], [0], [1], [0, 0, 1, 1], [], []>} : vector<16x128xf32>, vector<128x512xf32>, vector<16x512xf32> -> vector<16x512xf32>
    %c0_12 = arith.constant 0 : index
    %c0_13 = arith.constant 0 : index
    %27 = vector.load %arg5[%c0_12, %c0_13] : memref<1x512xf32, #tpu.memory_space<vmem>>, vector<1x512xf32>
    %28 = vector.broadcast %27 : vector<1x512xf32> to vector<16x512xf32>
    %29 = arith.addf %26, %28 : vector<16x512xf32>
    %30 = arith.negf %29 : vector<16x512xf32>
    %31 = math.exp %30 : vector<16x512xf32>
    %cst_14 = arith.constant 1.000000e+00 : f32
    %32 = vector.broadcast %cst_14 : f32 to vector<16x512xf32>
    %33 = arith.addf %32, %31 : vector<16x512xf32>
    %34 = arith.divf %32, %33 : vector<16x512xf32>
    %c0_15 = arith.constant 0 : index
    %c0_16 = arith.constant 0 : index
    %35 = vector.load %arg6[%c0_15, %c0_16] : memref<512x128xf32, #tpu.memory_space<vmem>>, vector<512x128xf32>
    %cst_17 = arith.constant dense<0.000000e+00> : vector<16x128xf32>
    %36 = tpu.matmul %34, %35, %cst_17 {dimension_numbers = #tpu.dot_dimension_numbers<[1], [0], [0], [1], [0, 0, 1, 1], [], []>} : vector<16x512xf32>, vector<512x128xf32>, vector<16x128xf32> -> vector<16x128xf32>
    %c0_18 = arith.constant 0 : index
    %c0_19 = arith.constant 0 : index
    %37 = vector.load %arg7[%c0_18, %c0_19] : memref<1x128xf32, #tpu.memory_space<vmem>>, vector<1x128xf32>
    %38 = vector.broadcast %37 : vector<1x128xf32> to vector<16x128xf32>
    %39 = arith.addf %36, %38 : vector<16x128xf32>
    %40 = arith.addf %39, %24 : vector<16x128xf32>
    %c0_20 = arith.constant 0 : index
    %c0_21 = arith.constant 0 : index
    %41 = vector.load %arg8[%c0_20, %c0_21] : memref<1x128xf32, #tpu.memory_space<vmem>>, vector<1x128xf32>
    %c0_22 = arith.constant 0 : index
    %c0_23 = arith.constant 0 : index
    %42 = vector.load %arg9[%c0_22, %c0_23] : memref<1x128xf32, #tpu.memory_space<vmem>>, vector<1x128xf32>
    %cst_24 = arith.constant dense<0.000000e+00> : vector<16xf32>
    %43 = vector.multi_reduction <add>, %40, %cst_24 [1] : vector<16x128xf32> to vector<16xf32>
    %44 = vector.shape_cast %43 : vector<16xf32> to vector<16x1xf32>
    %cst_25 = arith.constant 1.280000e+02 : f32
    %45 = vector.broadcast %cst_25 : f32 to vector<16x1xf32>
    %46 = arith.divf %44, %45 : vector<16x1xf32>
    %47 = vector.broadcast %46 : vector<16x1xf32> to vector<16x128xf32>
    %48 = arith.subf %40, %47 : vector<16x128xf32>
    %49 = arith.mulf %48, %48 : vector<16x128xf32>
    %cst_26 = arith.constant dense<0.000000e+00> : vector<16xf32>
    %50 = vector.multi_reduction <add>, %49, %cst_26 [1] : vector<16x128xf32> to vector<16xf32>
    %51 = vector.shape_cast %50 : vector<16xf32> to vector<16x1xf32>
    %cst_27 = arith.constant 1.280000e+02 : f32
    %52 = vector.broadcast %cst_27 : f32 to vector<16x1xf32>
    %53 = arith.divf %51, %52 : vector<16x1xf32>
    %54 = vector.broadcast %46 : vector<16x1xf32> to vector<16x128xf32>
    %55 = arith.subf %40, %54 : vector<16x128xf32>
    %cst_28 = arith.constant 9.99999974E-6 : f32
    %56 = vector.broadcast %cst_28 : f32 to vector<16x1xf32>
    %57 = arith.addf %53, %56 : vector<16x1xf32>
    %58 = math.rsqrt %57 : vector<16x1xf32>
    %59 = vector.broadcast %58 : vector<16x1xf32> to vector<16x128xf32>
    %60 = arith.mulf %55, %59 : vector<16x128xf32>
    %61 = vector.broadcast %41 : vector<1x128xf32> to vector<16x128xf32>
    %62 = arith.mulf %60, %61 : vector<16x128xf32>
    %63 = vector.broadcast %42 : vector<1x128xf32> to vector<16x128xf32>
    %64 = arith.addf %62, %63 : vector<16x128xf32>
    %c0_29 = arith.constant 0 : index
    %c0_30 = arith.constant 0 : index
    %65 = vector.load %arg10[%c0_29, %c0_30] : memref<16x128xf32, #tpu.memory_space<vmem>>, vector<16x128xf32>
    tpu.vector_store %arg10[%c0_29, %c0_30], %64 {strides = array<i32>} : memref<16x128xf32, #tpu.memory_space<vmem>>, vector<16x128xf32>,
    return
  }
  func.func @transform_0(%arg0: i32) -> (i32, i32) {
    %c0_i32 = arith.constant 0 : i32
    %c0_i32_0 = arith.constant 0 : i32
    return %arg0, %c0_i32 : i32, i32
  }
  func.func @transform_1(%arg0: i32) -> (i32, i32) {
    %c0_i32 = arith.constant 0 : i32
    %c0_i32_0 = arith.constant 0 : i32
    %c0_i32_1 = arith.constant 0 : i32
    return %c0_i32, %c0_i32_0 : i32, i32
  }
  func.func @transform_2(%arg0: i32) -> (i32, i32) {
    %c0_i32 = arith.constant 0 : i32
    %c0_i32_0 = arith.constant 0 : i32
    %c0_i32_1 = arith.constant 0 : i32
    return %c0_i32, %c0_i32_0 : i32, i32
  }
  func.func @transform_3(%arg0: i32) -> (i32, i32) {
    %c0_i32 = arith.constant 0 : i32
    %c0_i32_0 = arith.constant 0 : i32
    %c0_i32_1 = arith.constant 0 : i32
    return %c0_i32, %c0_i32_0 : i32, i32
  }
  func.func @transform_4(%arg0: i32) -> (i32, i32) {
    %c0_i32 = arith.constant 0 : i32
    %c0_i32_0 = arith.constant 0 : i32
    %c0_i32_1 = arith.constant 0 : i32
    return %c0_i32, %c0_i32_0 : i32, i32
  }
  func.func @transform_5(%arg0: i32) -> (i32, i32) {
    %c0_i32 = arith.constant 0 : i32
    %c0_i32_0 = arith.constant 0 : i32
    %c0_i32_1 = arith.constant 0 : i32
    return %c0_i32, %c0_i32_0 : i32, i32
  }
  func.func @transform_6(%arg0: i32) -> (i32, i32) {
    %c0_i32 = arith.constant 0 : i32
    %c0_i32_0 = arith.constant 0 : i32
    %c0_i32_1 = arith.constant 0 : i32
    return %c0_i32, %c0_i32_0 : i32, i32
  }
  func.func @transform_7(%arg0: i32) -> (i32, i32) {
    %c0_i32 = arith.constant 0 : i32
    %c0_i32_0 = arith.constant 0 : i32
    %c0_i32_1 = arith.constant 0 : i32
    return %c0_i32, %c0_i32_0 : i32, i32
  }
  func.func @transform_8(%arg0: i32) -> (i32, i32) {
    %c0_i32 = arith.constant 0 : i32
    %c0_i32_0 = arith.constant 0 : i32
    %c0_i32_1 = arith.constant 0 : i32
    return %c0_i32, %c0_i32_0 : i32, i32
  }
  func.func @transform_9(%arg0: i32) -> (i32, i32) {
    %c0_i32 = arith.constant 0 : i32
    %c0_i32_0 = arith.constant 0 : i32
    return %arg0, %c0_i32 : i32, i32
  }
}

</mosaic_0001>

<bundles_post_ra>
// kernel: tpu_custom_call.1
= control target key start
LH: loop header
LB: loop body
LE: loop exit
PB: predicated region body
PF: predicated region fallthrough
CT: control target
= control target key end

     0   :  { %14 = vsyncpa [#allocation3], 0  ;;  %s1030_s0 = inlined_call_operand.hbm [shape: f32[16,128], index: 0, kind: input, shape index: {}]   ;;  %s1031_s1 = inlined_call_operand.vmem [shape: f32[1,128], index: 1, kind: input, shape index: {}]   ;;  %s1032_s2 = inlined_call_operand.vmem [shape: f32[1,128], index: 2, kind: input, shape index: {}]   ;;  %s1033_s3 = inlined_call_operand.hbm [shape: f32[128,512], index: 3, kind: input, shape index: {}]   ;;  %s1034_s4 = inlined_call_operand.vmem [shape: f32[1,512], index: 4, kind: input, shape index: {}]   ;;  %s1035_s5 = inlined_call_operand.hbm [shape: f32[512,128], index: 5, kind: input, shape index: {}]   ;;  %s1036_s6 = inlined_call_operand.vmem [shape: f32[1,128], index: 6, kind: input, shape index: {}]   ;;  %s1037_s7 = inlined_call_operand.vmem [shape: f32[1,128], index: 7, kind: input, shape index: {}]   ;;  %s1038_s8 = inlined_call_operand.vmem [shape: f32[1,128], index: 8, kind: input, shape index: {}]   ;;  %s1039_s9 = inlined_call_operand.hbm [shape: f32[16,128], index: 9, kind: output, shape index: {}]  }
   0x1   :  { %15 = vsyncpa [#allocation6], 0 }
   0x2   :  { %16 = vsyncpa [#allocation4], 0  ;;  %s912_s30 = smov [#allocation5]  }
   0x3   :  { %s38_s10 = sshll.u32 %s912_s30, 4  ;;  %s39_s10 = int_to_ptr.vmem [resolvable:$true] %s38_s10 }
   0x4   :  { %s834_s11 = scalar_lea.vmem %s39_s10, 8192  ;;  %p839_p1 = scmp.lt.s32.totalorder %s39_s10, %s39_s10 }
   0x5   :  { %p835_p0 = scmp.ne.s32.totalorder %s39_s10, %s834_s11  ;;  %p840_p2 = scmp.lt.s32.totalorder %s834_s11, %s834_s11 }
   0x7   :  { %p841_p3 = por %p840_p2, %p839_p1 }
   0x9   :  { %p842_p4 = pnand %p841_p3, %p835_p0 }
   0xb   :  { %845 = shalt.err (!%p842_p4)
}
   0xc   :  { %s913_s12 = smov 512   ;;  %s914_s13 = smov 32  }
   0xd   :  { %44 = dma.hbm_to_vmem [thread:$0]  %s1033_s3, 8192, %s39_s10, [#allocation6], %s913_s12, %s913_s12, %s914_s13  }
   0xe   :  { %s915_s16 = smov [#allocation2]  }
   0xf   :  { %s22_s17 = sshll.u32 %s915_s16, 4  ;;  %s23_s17 = int_to_ptr.vmem [resolvable:$true] %s22_s17 }
  0x10   :  { %s854_s18 = scalar_lea.vmem %s23_s17, 256  ;;  %p859_p6 = scmp.lt.s32.totalorder %s23_s17, %s23_s17 }
  0x11   :  { %p855_p5 = scmp.ne.s32.totalorder %s23_s17, %s854_s18  ;;  %p860_p7 = scmp.lt.s32.totalorder %s854_s18, %s854_s18 }
  0x13   :  { %p861_p8 = por %p860_p7, %p859_p6 }
  0x15   :  { %p862_p9 = pnand %p861_p8, %p855_p5 }
  0x17   :  { %865 = shalt.err (!%p862_p9)
}
  0x18   :  { %s916_s19 = smov 128   ;;  %s917_s20 = smov 8  }
  0x19   :  { %28 = dma.hbm_to_vmem [thread:$0]  %s1030_s0, 256, %s23_s17, [#allocation3], %s916_s19, %s916_s19, %s917_s20  }
  0x1a   :  { %s918_s3 = smov [#allocation7]  }
  0x1b   :  { %s52_s23 = sshll.u32 %s918_s3, 4  ;;  %s53_s23 = int_to_ptr.vmem [resolvable:$true] %s52_s23 }
  0x1c   :  { %s874_s24 = scalar_lea.vmem %s53_s23, 8192  ;;  %p879_p11 = scmp.lt.s32.totalorder %s53_s23, %s53_s23 }
  0x1d   :  { %p875_p10 = scmp.ne.s32.totalorder %s53_s23, %s874_s24  ;;  %p880_p12 = scmp.lt.s32.totalorder %s874_s24, %s874_s24 }
  0x1f   :  { %p881_p13 = por %p880_p12, %p879_p11 }
  0x21   :  { %p882_p0 = pnand %p881_p13, %p875_p10 }
  0x23   :  { %885 = shalt.err (!%p882_p0)
}
  0x24   :  { %58 = dma.hbm_to_vmem [thread:$0]  %s1035_s5, 8192, %s53_s23, [#allocation6], %s916_s19, %s916_s19, %s917_s20  }
  0x25   :  { %906 = dma.done.wait [#allocation3], 256  }
  0x26   :  { %907 = vsyncadd [#allocation3], 4294967040 }
  0x27   :  { %908 = dma.done.wait [#allocation6], 16384  }
  0x28   :  { %909 = vsyncadd [#allocation6], 4294950912  ;;  %v74_v0 = vld [vmem:[#allocation2] sm:$0xff]  ;;  %v75_v1 = vld [vmem:[#allocation2 + $0x8] sm:$0xff]  ;;  %s920_s12 = smov [#allocation8]  }
  0x29   :  { %78 = vadd.xlane.f32.xlu0 %v74_v0  ;;  %v178_v2 = vld [vmem:[#allocation5 + $0x1e8] sm:$0xff]  ;;  %v180_v3 = vld [vmem:[#allocation5 + $0x1f8] sm:$0xff]  ;;  %v177_v4 = vld [vmem:[#allocation5 + $0x1e0] sm:$0xff]  ;;  %s675_s13 = sshll.u32 %s920_s12, 4  ;;  %s676_s13 = int_to_ptr.vmem [resolvable:$true] %s675_s13 }
  0x2a   :  { %203 = vmatprep.subr.mxu0 %v178_v2  ;;  %280 = vmatprep.subr.mxu1 %v180_v3  ;;  %v179_v5 = vld [vmem:[#allocation5 + $0x1f0] sm:$0xff]  ;;  %v174_v6 = vld [vmem:[#allocation5 + $0x1c8] sm:$0xff]  ;;  %v176_v7 = vld [vmem:[#allocation5 + $0x1d8] sm:$0xff]  ;;  %s886_s14 = scalar_lea.vmem %s676_s13, 256  ;;  %p891_p2 = scmp.lt.s32.totalorder %s676_s13, %s676_s13 }
  0x2b   :  { %204 = vmatpush1.msra.mxu0 %v177_v4  ;;  %281 = vmatpush1.msra.mxu1 %v179_v5  ;;  %v173_v8 = vld [vmem:[#allocation5 + $0x1c0] sm:$0xff]  ;;  %v175_v9 = vld [vmem:[#allocation5 + $0x1d0] sm:$0xff]  ;;  %v170_v10 = vld [vmem:[#allocation5 + $0x1a8] sm:$0xff]  ;;  %p887_p1 = scmp.ne.s32.totalorder %s676_s13, %s886_s14  ;;  %p892_p3 = scmp.lt.s32.totalorder %s886_s14, %s886_s14 }
  0x2c   :  { %205 = vmatprep.subr.mxu0 %v174_v6  ;;  %282 = vmatprep.subr.mxu1 %v176_v7  ;;  %v172_v11 = vld [vmem:[#allocation5 + $0x1b8] sm:$0xff]  ;;  %v169_v12 = vld [vmem:[#allocation5 + $0x1a0] sm:$0xff]  ;;  %v171_v13 = vld [vmem:[#allocation5 + $0x1b0] sm:$0xff] }
  0x2d   :  { %80 = vadd.xlane.f32.xlu0 %v75_v1  ;;  %206 = vmatpush1.msra.mxu0 %v173_v8  ;;  %v166_v14 = vld [vmem:[#allocation5 + $0x188] sm:$0xff]  ;;  %v168_v15 = vld [vmem:[#allocation5 + $0x198] sm:$0xff]  ;;  %v165_v16 = vld [vmem:[#allocation5 + $0x180] sm:$0xff]  ;;  %p893_p4 = por %p892_p3, %p891_p2 }
  0x2e   :  { %283 = vmatpush1.msra.mxu1 %v175_v9  ;;  %207 = vmatprep.subr.mxu0 %v170_v10  ;;  %v167_v17 = vld [vmem:[#allocation5 + $0x190] sm:$0xff]  ;;  %v162_v26 = vld [vmem:[#allocation5 + $0x168] sm:$0xff]  ;;  %v164_v27 = vld [vmem:[#allocation5 + $0x178] sm:$0xff]  ;;  %v919_v10 = vmov 0.0  }
  0x2f   :  { %284 = vmatprep.subr.mxu1 %v172_v11  ;;  %208 = vmatpush1.msra.mxu0 %v169_v12  ;;  %v161_v28 = vld [vmem:[#allocation5 + $0x160] sm:$0xff]  ;;  %v163_v29 = vld [vmem:[#allocation5 + $0x170] sm:$0xff]  ;;  %v158_v30 = vld [vmem:[#allocation5 + $0x148] sm:$0xff]  ;;  %p894_p5 = pnand %p893_p4, %p887_p1 }
  0x30   :  { %285 = vmatpush1.msra.mxu1 %v171_v13  ;;  %209 = vmatprep.subr.mxu0 %v166_v14  ;;  %v160_v31 = vld [vmem:[#allocation5 + $0x158] sm:$0xff]  ;;  %v157_v32 = vld [vmem:[#allocation5 + $0x140] sm:$0xff]  ;;  %v159_v33 = vld [vmem:[#allocation5 + $0x150] sm:$0xff] }
  0x31   :  { %286 = vmatprep.subr.mxu1 %v168_v15  ;;  %210 = vmatpush1.msra.mxu0 %v165_v16  ;;  %v154_v34 = vld [vmem:[#allocation5 + $0x128] sm:$0xff]  ;;  %v156_v35 = vld [vmem:[#allocation5 + $0x138] sm:$0xff]  ;;  %v153_v36 = vld [vmem:[#allocation5 + $0x120] sm:$0xff] }
  0x32   :  { %287 = vmatpush1.msra.mxu1 %v167_v17  ;;  %211 = vmatprep.subr.mxu0 %v162_v26  ;;  %v155_v37 = vld [vmem:[#allocation5 + $0x130] sm:$0xff]  ;;  %v150_v38 = vld [vmem:[#allocation5 + $0x108] sm:$0xff]  ;;  %v152_v39 = vld [vmem:[#allocation5 + $0x118] sm:$0xff] }
  0x33   :  { %288 = vmatprep.subr.mxu1 %v164_v27  ;;  %212 = vmatpush1.msra.mxu0 %v161_v28  ;;  %v149_v40 = vld [vmem:[#allocation5 + $0x100] sm:$0xff]  ;;  %v151_v41 = vld [vmem:[#allocation5 + $0x110] sm:$0xff]  ;;  %v146_v42 = vld [vmem:[#allocation5 + $0xe8] sm:$0xff] }
  0x34   :  { %289 = vmatpush1.msra.mxu1 %v163_v29  ;;  %213 = vmatprep.subr.mxu0 %v158_v30  ;;  %v148_v43 = vld [vmem:[#allocation5 + $0xf8] sm:$0xff]  ;;  %v145_v44 = vld [vmem:[#allocation5 + $0xe0] sm:$0xff]  ;;  %v147_v45 = vld [vmem:[#allocation5 + $0xf0] sm:$0xff] }
  0x35   :  { %290 = vmatprep.subr.mxu1 %v160_v31  ;;  %214 = vmatpush1.msra.mxu0 %v157_v32  ;;  %v142_v46 = vld [vmem:[#allocation5 + $0xc8] sm:$0xff]  ;;  %v144_v47 = vld [vmem:[#allocation5 + $0xd8] sm:$0xff]  ;;  %v141_v48 = vld [vmem:[#allocation5 + $0xc0] sm:$0xff] }
  0x36   :  { %291 = vmatpush1.msra.mxu1 %v159_v33  ;;  %215 = vmatprep.subr.mxu0 %v154_v34  ;;  %v143_v49 = vld [vmem:[#allocation5 + $0xd0] sm:$0xff]  ;;  %v138_v50 = vld [vmem:[#allocation5 + $0xa8] sm:$0xff]  ;;  %v140_v51 = vld [vmem:[#allocation5 + $0xb8] sm:$0xff] }
  0x37   :  { %292 = vmatprep.subr.mxu1 %v156_v35  ;;  %216 = vmatpush1.msra.mxu0 %v153_v36  ;;  %v137_v52 = vld [vmem:[#allocation5 + $0xa0] sm:$0xff]  ;;  %v139_v53 = vld [vmem:[#allocation5 + $0xb0] sm:$0xff]  ;;  %v134_v54 = vld [vmem:[#allocation5 + $0x88] sm:$0xff] }
  0x38   :  { %293 = vmatpush1.msra.mxu1 %v155_v37  ;;  %217 = vmatprep.subr.mxu0 %v150_v38  ;;  %v136_v55 = vld [vmem:[#allocation5 + $0x98] sm:$0xff]  ;;  %v133_v56 = vld [vmem:[#allocation5 + $0x80] sm:$0xff]  ;;  %v135_v57 = vld [vmem:[#allocation5 + $0x90] sm:$0xff] }
  0x39   :  { %294 = vmatprep.subr.mxu1 %v152_v39  ;;  %218 = vmatpush1.msra.mxu0 %v149_v40  ;;  %v130_v58 = vld [vmem:[#allocation5 + $0x68] sm:$0xff]  ;;  %v132_v59 = vld [vmem:[#allocation5 + $0x78] sm:$0xff]  ;;  %v129_v60 = vld [vmem:[#allocation5 + $0x60] sm:$0xff] }
  0x3a   :  { %295 = vmatpush1.msra.mxu1 %v151_v41  ;;  %219 = vmatprep.subr.mxu0 %v146_v42  ;;  %v131_v61 = vld [vmem:[#allocation5 + $0x70] sm:$0xff]  ;;  %v126_v62 = vld [vmem:[#allocation5 + $0x48] sm:$0xff]  ;;  %v128_v63 = vld [vmem:[#allocation5 + $0x58] sm:$0xff] }
  0x3b   :  { %296 = vmatprep.subr.mxu1 %v148_v43  ;;  %220 = vmatpush1.msra.mxu0 %v145_v44  ;;  %v122_v2 = vld [vmem:[#allocation5 + $0x28] sm:$0xff]  ;;  %v124_v3 = vld [vmem:[#allocation5 + $0x38] sm:$0xff]  ;;  %v121_v4 = vld [vmem:[#allocation5 + $0x20] sm:$0xff] }
  0x3c   :  { %297 = vmatpush1.msra.mxu1 %v147_v45  ;;  %221 = vmatprep.subr.mxu0 %v142_v46  ;;  %v123_v5 = vld [vmem:[#allocation5 + $0x30] sm:$0xff]  ;;  %v118_v6 = vld [vmem:[#allocation5 + $0x8] sm:$0xff]  ;;  %v120_v7 = vld [vmem:[#allocation5 + $0x18] sm:$0xff] }
  0x3d   :  { %298 = vmatprep.subr.mxu1 %v144_v47  ;;  %222 = vmatpush1.msra.mxu0 %v141_v48  ;;  %v117_v8 = vld [vmem:[#allocation5] sm:$0xff]  ;;  %v119_v9 = vld [vmem:[#allocation5 + $0x10] sm:$0xff]  ;;  %v468_v29 = vld [vmem:[#allocation7 + $0x1f8] sm:$0xff] }
  0x3e   :  { %299 = vmatpush1.msra.mxu1 %v143_v49  ;;  %223 = vmatprep.subr.mxu0 %v138_v50  ;;  %v420_v30 = vld [vmem:[#allocation7 + $0x78] sm:$0xff]  ;;  %v467_v32 = vld [vmem:[#allocation7 + $0x1f0] sm:$0xff]  ;;  %v434_v35 = vld [vmem:[#allocation7 + $0xe8] sm:$0xff] }
  0x3f   :  { %300 = vmatprep.subr.mxu1 %v140_v51  ;;  %224 = vmatpush1.msra.mxu0 %v137_v52  ;;  %v452_v31 = vld [vmem:[#allocation7 + $0x178] sm:$0xff]  ;;  %v419_v33 = vld [vmem:[#allocation7 + $0x70] sm:$0xff]  ;;  %v466_v36 = vld [vmem:[#allocation7 + $0x1e8] sm:$0xff] }
  0x40   :  { %301 = vmatpush1.msra.mxu1 %v139_v53  ;;  %225 = vmatprep.subr.mxu0 %v134_v54  ;;  %v451_v34 = vld [vmem:[#allocation7 + $0x170] sm:$0xff]  ;;  %v418_v37 = vld [vmem:[#allocation7 + $0x68] sm:$0xff]  ;;  %v433_v39 = vld [vmem:[#allocation7 + $0xe0] sm:$0xff] }
  0x41   :  { %302 = vmatprep.subr.mxu1 %v136_v55  ;;  %226 = vmatpush1.msra.mxu0 %v133_v56  ;;  %v450_v38 = vld [vmem:[#allocation7 + $0x168] sm:$0xff]  ;;  %v465_v40 = vld [vmem:[#allocation7 + $0x1e0] sm:$0xff]  ;;  %v432_v43 = vld [vmem:[#allocation7 + $0xd8] sm:$0xff] }
  0x42   :  { %303 = vmatpush1.msra.mxu1 %v135_v57  ;;  %227 = vmatprep.subr.mxu0 %v130_v58  ;;  %v417_v41 = vld [vmem:[#allocation7 + $0x60] sm:$0xff]  ;;  %v464_v44 = vld [vmem:[#allocation7 + $0x1d8] sm:$0xff]  ;;  %v431_v47 = vld [vmem:[#allocation7 + $0xd0] sm:$0xff] }
  0x43   :  { %304 = vmatprep.subr.mxu1 %v132_v59  ;;  %228 = vmatpush1.msra.mxu0 %v129_v60  ;;  %v449_v42 = vld [vmem:[#allocation7 + $0x160] sm:$0xff]  ;;  %v416_v45 = vld [vmem:[#allocation7 + $0x58] sm:$0xff]  ;;  %v463_v48 = vld [vmem:[#allocation7 + $0x1d0] sm:$0xff] }
  0x44   :  { %305 = vmatpush1.msra.mxu1 %v131_v61  ;;  %229 = vmatprep.subr.mxu0 %v126_v62  ;;  %v448_v46 = vld [vmem:[#allocation7 + $0x158] sm:$0xff]  ;;  %v415_v49 = vld [vmem:[#allocation7 + $0x50] sm:$0xff]  ;;  %v430_v51 = vld [vmem:[#allocation7 + $0xc8] sm:$0xff] }
  0x45   :  { %306 = vmatprep.subr.mxu1 %v128_v63  ;;  %267 = vmatprep.mubr.f32.mxu0 %v919_v10  ;;  %v447_v50 = vld [vmem:[#allocation7 + $0x150] sm:$0xff]  ;;  %v462_v52 = vld [vmem:[#allocation7 + $0x1c8] sm:$0xff]  ;;  %v429_v55 = vld [vmem:[#allocation7 + $0xc0] sm:$0xff] }
  0x46   :  { %344 = vmatprep.mubr.f32.mxu1 %v919_v10  ;;  %v414_v53 = vld [vmem:[#allocation7 + $0x48] sm:$0xff]  ;;  %v461_v56 = vld [vmem:[#allocation7 + $0x1c0] sm:$0xff]  ;;  %v428_v59 = vld [vmem:[#allocation7 + $0xb8] sm:$0xff] }
  0x47   :  { %v446_v54 = vld [vmem:[#allocation7 + $0x148] sm:$0xff]  ;;  %v413_v57 = vld [vmem:[#allocation7 + $0x40] sm:$0xff]  ;;  %v460_v60 = vld [vmem:[#allocation7 + $0x1b8] sm:$0xff] }
  0x48   :  { %v445_v58 = vld [vmem:[#allocation7 + $0x140] sm:$0xff]  ;;  %v412_v61 = vld [vmem:[#allocation7 + $0x38] sm:$0xff]  ;;  %v427_v63 = vld [vmem:[#allocation7 + $0xb0] sm:$0xff] }
  0x49   :  { %v444_v62 = vld [vmem:[#allocation7 + $0x138] sm:$0xff] }
  0xb2   :  { %v79_v18 = vpop.xlane.xlu0 %78 }
  0xb3   :  { %v83_v19 = vmul.f32 0.0078125, %v79_v18  ;;  %v688_v18 = vld [vmem:[%s1031_s1] ss:$0 sm:$0xff] }
  0xb5   :  { %v986_v20 = vsub.f32 %v74_v0, %v83_v19  ;;  %v125_v0 = vld [vmem:[#allocation5 + $0x40] sm:$0xff] }
  0xb6   :  { %v81_v21 = vpop.xlane.xlu0 %80  ;;  %230 = vmatpush1.msra.mxu0 %v125_v0  ;;  %v459_v0 = vld [vmem:[#allocation7 + $0x1b0] sm:$0xff] }
  0xb7   :  { %v84_v22 = vmul.f32 0.0078125, %v81_v21  ;;  %v87_v23 = vmul.f32 %v986_v20, %v986_v20  ;;  %231 = vmatprep.subr.mxu0 %v122_v2  ;;  %v689_v21 = vld [vmem:[%s1032_s2] ss:$0 sm:$0xff] }
  0xb8   :  { %232 = vmatpush1.msra.mxu0 %v121_v4  ;;  %v443_v2 = vld [vmem:[#allocation7 + $0x130] sm:$0xff]  ;;  %v458_v4 = vld [vmem:[#allocation7 + $0x1a8] sm:$0xff] }
  0xb9   :  { %v990_v24 = vsub.f32 %v75_v1, %v84_v22  ;;  %89 = vadd.xlane.f32.xlu1 %v87_v23  ;;  %v127_v1 = vld [vmem:[#allocation5 + $0x50] sm:$0xff]  ;;  %233 = vmatprep.subr.mxu0 %v118_v6  ;;  %v442_v6 = vld [vmem:[#allocation7 + $0x128] sm:$0xff] }
  0xba   :  { %307 = vmatpush1.msra.mxu1 %v127_v1  ;;  %234 = vmatpush1.msra.mxu0 %v117_v8  ;;  %v411_v1 = vld [vmem:[#allocation7 + $0x30] sm:$0xff]  ;;  %v457_v8 = vld [vmem:[#allocation7 + $0x1a0] sm:$0xff] }
  0xbb   :  { %v88_v25 = vmul.f32 %v990_v24, %v990_v24  ;;  %308 = vmatprep.subr.mxu1 %v124_v3  ;;  %v426_v3 = vld [vmem:[#allocation7 + $0xa8] sm:$0xff] }
  0xbc   :  { %309 = vmatpush1.msra.mxu1 %v123_v5  ;;  %v410_v5 = vld [vmem:[#allocation7 + $0x28] sm:$0xff] }
  0xbd   :  { %91 = vadd.xlane.f32.xlu1 %v88_v25  ;;  %310 = vmatprep.subr.mxu1 %v120_v7  ;;  %v425_v7 = vld [vmem:[#allocation7 + $0xa0] sm:$0xff] }
  0xbe   :  { %311 = vmatpush1.msra.mxu1 %v119_v9  ;;  %v409_v9 = vld [vmem:[#allocation7 + $0x20] sm:$0xff] }
  0xbf   :  { %739 = vmatprep.subr.mxu1 %v468_v29  ;;  %v437_v29 = vld [vmem:[#allocation7 + $0x100] sm:$0xff] }
 0x142   :  { %v90_v11 = vpop.xlane.xlu1 %89 }
 0x143   :  { %v93_v12 = vmul.f32 0.0078125, %v90_v11  ;;  %v424_v11 = vld [vmem:[#allocation7 + $0x98] sm:$0xff] }
 0x145   :  { %v95_v13 = vadd.f32 1e-05, %v93_v12  ;;  %v456_v12 = vld [vmem:[#allocation7 + $0x198] sm:$0xff] }
 0x146   :  { %v92_v14 = vpop.xlane.xlu1 %91 }
 0x147   :  { %786 = vrsqrt.f32 %v95_v13  ;;  %v94_v15 = vmul.f32 0.0078125, %v92_v14  ;;  %v408_v13 = vld [vmem:[#allocation7 + $0x18] sm:$0xff] }
 0x148   :  { %v440_v14 = vld [vmem:[#allocation7 + $0x118] sm:$0xff] }
 0x149   :  { %v96_v16 = vadd.f32 1e-05, %v94_v15  ;;  %v423_v15 = vld [vmem:[#allocation7 + $0x90] sm:$0xff] }
 0x14b   :  { %788 = vrsqrt.f32 %v96_v16  ;;  %v455_v16 = vld [vmem:[#allocation7 + $0x190] sm:$0xff] }
 0x154   :  { %v787_v17 = vpop.eup %786 }
 0x155   :  { %v99_v19 = vmul.f32 %v787_v17, %v986_v20  ;;  %v436_v20 = vld [vmem:[#allocation7 + $0xf8] sm:$0xff]  ;;  %v407_v17 = vld [vmem:[#allocation7 + $0x10] sm:$0xff] }
 0x156   :  { %701 = vmatprep.subr.mxu0 %v436_v20  ;;  %v405_v20 = vld [vmem:[#allocation7] sm:$0xff] }
 0x157   :  { %v107_v22 = vmul.f32 %v688_v18, %v99_v19  ;;  %v422_v19 = vld [vmem:[#allocation7 + $0x88] sm:$0xff] }
 0x158   :  { %v789_v23 = vpop.eup %788 }
 0x159   :  { %v1001_v25 = vadd.f32 %v689_v21, %v107_v22  ;;  %v100_v26 = vmul.f32 %v789_v23, %v990_v24  ;;  %v435_v24 = vld [vmem:[#allocation7 + $0xf0] sm:$0xff]  ;;  %v406_v22 = vld [vmem:[#allocation7 + $0x8] sm:$0xff] }
 0x15a   :  { %v438_v23 = vld [vmem:[#allocation7 + $0x108] sm:$0xff] }
 0x15b   :  { %268 = vmatmul.mubr.f32.vlgmr.msra.gmra.mxu0 %v1001_v25  ;;  %345 = vmatmul.mubr.f32.vlgmr.msra.gmra.mxu1 %v1001_v25  ;;  %v108_v27 = vmul.f32 %v688_v18, %v100_v26  ;;  %v439_v18 = vld [vmem:[#allocation7 + $0x110] sm:$0xff]  ;;  %v421_v26 = vld [vmem:[#allocation7 + $0x80] sm:$0xff] }
 0x15c   :  { %273 = vmatprep.mubr.f32.mxu0 %v919_v10  ;;  %350 = vmatprep.mubr.f32.mxu1 %v919_v10  ;;  %v441_v10 = vld [vmem:[#allocation7 + $0x120] sm:$0xff] }
 0x15d   :  { %v1006_v28 = vadd.f32 %v689_v21, %v108_v27  ;;  %702 = vmatpush3.msra.mxu0 %v420_v30  ;;  %740 = vmatpush3.msra.mxu1 %v452_v31  ;;  %v454_v21 = vld [vmem:[#allocation7 + $0x188] sm:$0xff]  ;;  %v453_v27 = vld [vmem:[#allocation7 + $0x180] sm:$0xff]  ;;  %v183_v30 = vlaneseq }
 0x15e   :  { %703 = vmatprep.subr.mxu0 %v435_v24  ;;  %741 = vmatprep.subr.mxu1 %v467_v32 }
 0x15f   :  { %274 = vmatmul.mubr.f32.gmra.mxu0 %v1006_v28  ;;  %351 = vmatmul.mubr.f32.gmra.mxu1 %v1006_v28  ;;  %v184_v31 = vshrl.u32 %v183_v30, 7 }
 0x160   :  { %704 = vmatpush3.msra.mxu0 %v419_v33  ;;  %742 = vmatpush3.msra.mxu1 %v451_v34  ;;  %v181_v33 = vld [vmem:[%s1034_s4] sm:$0xf] }
 0x161   :  { %705 = vmatprep.subr.mxu0 %v434_v35  ;;  %743 = vmatprep.subr.mxu1 %v466_v36  ;;  %v185_v24 = vsub.s32 0, %v184_v31  ;;  %v193_v32 = vsub.s32 2, %v184_v31  ;;  %v189_v34 = vsub.s32 1, %v184_v31  ;;  %v197_v35 = vsub.s32 3, %v184_v31 }
 0x162   :  { %706 = vmatpush3.msra.mxu0 %v418_v37  ;;  %744 = vmatpush3.msra.mxu1 %v450_v38 }
 0x163   :  { %707 = vmatprep.subr.mxu0 %v433_v39  ;;  %745 = vmatprep.subr.mxu1 %v465_v40  ;;  %v186_v36 = vrot.slane %v181_v33, %v185_v24  ;;  %v194_v37 = vrot.slane %v181_v33, %v193_v32  ;;  %v190_v38 = vrot.slane %v181_v33, %v189_v34 }
 0x164   :  { %708 = vmatpush3.msra.mxu0 %v417_v41  ;;  %746 = vmatpush3.msra.mxu1 %v449_v42  ;;  %v198_v39 = vrot.slane %v181_v33, %v197_v35 }
 0x165   :  { %709 = vmatprep.subr.mxu0 %v432_v43  ;;  %747 = vmatprep.subr.mxu1 %v464_v44 }
 0x166   :  { %710 = vmatpush3.msra.mxu0 %v416_v45  ;;  %748 = vmatpush3.msra.mxu1 %v448_v46 }
 0x167   :  { %711 = vmatprep.subr.mxu0 %v431_v47  ;;  %749 = vmatprep.subr.mxu1 %v463_v48 }
 0x168   :  { %712 = vmatpush3.msra.mxu0 %v415_v49  ;;  %750 = vmatpush3.msra.mxu1 %v447_v50 }
 0x169   :  { %713 = vmatprep.subr.mxu0 %v430_v51  ;;  %751 = vmatprep.subr.mxu1 %v462_v52 }
 0x16a   :  { %714 = vmatpush3.msra.mxu0 %v414_v53  ;;  %752 = vmatpush3.msra.mxu1 %v446_v54 }
 0x16b   :  { %715 = vmatprep.subr.mxu0 %v429_v55  ;;  %753 = vmatprep.subr.mxu1 %v461_v56 }
 0x16c   :  { %716 = vmatpush3.msra.mxu0 %v413_v57  ;;  %754 = vmatpush3.msra.mxu1 %v445_v58 }
 0x16d   :  { %717 = vmatprep.subr.mxu0 %v428_v59  ;;  %755 = vmatprep.subr.mxu1 %v460_v60 }
 0x16e   :  { %718 = vmatpush3.msra.mxu0 %v412_v61  ;;  %756 = vmatpush3.msra.mxu1 %v444_v62 }
 0x16f   :  { %719 = vmatprep.subr.mxu0 %v427_v63  ;;  %757 = vmatprep.subr.mxu1 %v459_v0 }
 0x170   :  { %720 = vmatpush3.msra.mxu0 %v411_v1  ;;  %758 = vmatpush3.msra.mxu1 %v443_v2 }
 0x171   :  { %721 = vmatprep.subr.mxu0 %v426_v3  ;;  %759 = vmatprep.subr.mxu1 %v458_v4 }
 0x172   :  { %722 = vmatpush3.msra.mxu0 %v410_v5  ;;  %760 = vmatpush3.msra.mxu1 %v442_v6 }
 0x173   :  { %723 = vmatprep.subr.mxu0 %v425_v7  ;;  %761 = vmatprep.subr.mxu1 %v457_v8 }
 0x174   :  { %724 = vmatpush3.msra.mxu0 %v409_v9  ;;  %762 = vmatpush3.msra.mxu1 %v441_v10 }
 0x175   :  { %725 = vmatprep.subr.mxu0 %v424_v11  ;;  %763 = vmatprep.subr.mxu1 %v456_v12 }
 0x176   :  { %726 = vmatpush3.msra.mxu0 %v408_v13  ;;  %764 = vmatpush3.msra.mxu1 %v440_v14 }
 0x177   :  { %727 = vmatprep.subr.mxu0 %v423_v15  ;;  %765 = vmatprep.subr.mxu1 %v455_v16 }
 0x178   :  { %728 = vmatpush3.msra.mxu0 %v407_v17  ;;  %766 = vmatpush3.msra.mxu1 %v439_v18 }
 0x179   :  { %729 = vmatprep.subr.mxu0 %v422_v19  ;;  %767 = vmatprep.subr.mxu1 %v454_v21 }
 0x17a   :  { %730 = vmatpush3.msra.mxu0 %v406_v22  ;;  %768 = vmatpush3.msra.mxu1 %v438_v23 }
 0x17b   :  { %731 = vmatprep.subr.mxu0 %v421_v26  ;;  %769 = vmatprep.subr.mxu1 %v453_v27 }
 0x17c   :  { %732 = vmatpush3.msra.mxu0 %v405_v20  ;;  %770 = vmatpush3.msra.mxu1 %v437_v29  ;;  %v698_v29 = vld [vmem:[%s1036_s6] ss:$0 sm:$0xff] }
 0x21b   :  { %v269_v40 = vpop.f32.mrf.mxu0  ;;  %v346_v41 = vpop.f32.mrf.mxu1 }
 0x21c   :  { %v270_v42 = vadd.f32 %v269_v40, %v186_v36  ;;  %v347_v43 = vadd.f32 %v346_v41, %v194_v37 }
 0x21d   :  { %v271_v44 = vpop.f32.mrf.mxu0  ;;  %v348_v45 = vpop.f32.mrf.mxu1 }
 0x21e   :  { %v690_v46 = vmul.f32 -1.442695, %v270_v42  ;;  %v692_v47 = vmul.f32 -1.442695, %v347_v43  ;;  %v272_v48 = vadd.f32 %v271_v44, %v190_v38  ;;  %v349_v49 = vadd.f32 %v348_v45, %v198_v39 }
 0x21f   :  { %v275_v50 = vpop.f32.mrf.mxu0  ;;  %v352_v51 = vpop.f32.mrf.mxu1 }
 0x220   :  { %790 = vpow2.f32 %v690_v46  ;;  %v691_v52 = vmul.f32 -1.442695, %v272_v48  ;;  %v693_v53 = vmul.f32 -1.442695, %v349_v49  ;;  %v276_v54 = vadd.f32 %v275_v50, %v186_v36 }
 0x221   :  { %792 = vpow2.f32 %v692_v47  ;;  %v353_v55 = vadd.f32 %v352_v51, %v194_v37  ;;  %v277_v56 = vpop.f32.mrf.mxu0  ;;  %v354_v57 = vpop.f32.mrf.mxu1 }
 0x222   :  { %794 = vpow2.f32 %v691_v52  ;;  %v694_v58 = vmul.f32 -1.442695, %v276_v54  ;;  %v278_v59 = vadd.f32 %v277_v56, %v190_v38  ;;  %v355_v60 = vadd.f32 %v354_v57, %v198_v39 }
 0x223   :  { %796 = vpow2.f32 %v693_v53  ;;  %v696_v61 = vmul.f32 -1.442695, %v353_v55 }
 0x224   :  { %798 = vpow2.f32 %v694_v58  ;;  %v695_v62 = vmul.f32 -1.442695, %v278_v59  ;;  %v697_v63 = vmul.f32 -1.442695, %v355_v60  ;;  %v699_v58 = vld [vmem:[%s1037_s7] ss:$0 sm:$0xff] }
 0x225   :  { %800 = vpow2.f32 %v696_v61  ;;  %v700_v60 = vld [vmem:[%s1038_s8] ss:$0 sm:$0xff] }
 0x226   :  { %802 = vpow2.f32 %v695_v62 }
 0x227   :  { %804 = vpow2.f32 %v697_v63 }
 0x22d   :  { %v791_v0 = vpop.eup %790 }
 0x22e   :  { %v793_v1 = vpop.eup %792  ;;  %v381_v2 = vadd.f32 1.0, %v791_v0 }
 0x22f   :  { %v795_v3 = vpop.eup %794  ;;  %v383_v5 = vadd.f32 1.0, %v793_v1 }
 0x230   :  { %v797_v4 = vpop.eup %796  ;;  %v382_v6 = vadd.f32 1.0, %v795_v3  ;;  %806 = vrcp.f32 %v381_v2 }
 0x231   :  { %v799_v7 = vpop.eup %798  ;;  %v384_v8 = vadd.f32 1.0, %v797_v4 }
 0x232   :  { %v801_v9 = vpop.eup %800  ;;  %808 = vrcp.f32 %v382_v6  ;;  %v385_v10 = vadd.f32 1.0, %v799_v7 }
 0x233   :  { %v803_v11 = vpop.eup %802  ;;  %810 = vrcp.f32 %v384_v8  ;;  %v387_v13 = vadd.f32 1.0, %v801_v9 }
 0x234   :  { %v805_v12 = vpop.eup %804  ;;  %812 = vrcp.f32 %v383_v5  ;;  %v386_v14 = vadd.f32 1.0, %v803_v11 }
 0x235   :  { %814 = vrcp.f32 %v385_v10  ;;  %v388_v15 = vadd.f32 1.0, %v805_v12 }
 0x236   :  { %816 = vrcp.f32 %v386_v14 }
 0x237   :  { %818 = vrcp.f32 %v388_v15 }
 0x238   :  { %820 = vrcp.f32 %v387_v13 }
 0x23d   :  { %v807_v16 = vpop.eup %806 }
 0x23f   :  { %v809_v17 = vpop.eup %808 }
 0x240   :  { %v811_v18 = vpop.eup %810  ;;  %540 = vmatprep.mubr.f32.mxu0 %v809_v17 }
 0x241   :  { %v813_v19 = vpop.eup %812  ;;  %615 = vmatprep.mubr.f32.mxu1 %v811_v18  ;;  %541 = vmatmul.mubr.f32.vlgmr.msra.gmra.mxu0 %v807_v16 }
 0x242   :  { %v815_v21 = vpop.eup %814  ;;  %616 = vmatmul.mubr.f32.vlgmr.msra.gmra.mxu1 %v813_v19 }
 0x243   :  { %v817_v22 = vpop.eup %816 }
 0x244   :  { %v819_v23 = vpop.eup %818  ;;  %545 = vmatprep.mubr.f32.mxu0 %v817_v22 }
 0x245   :  { %v821_v26 = vpop.eup %820  ;;  %620 = vmatprep.mubr.f32.mxu1 %v819_v23  ;;  %546 = vmatmul.mubr.f32.gmra.mxu0 %v815_v21 }
 0x246   :  { %621 = vmatmul.mubr.f32.gmra.mxu1 %v821_v26 }
 0x301   :  { %v733_v27 = vpop.f32.mrf.mxu0 }
 0x302   :  { %v771_v20 = vpop.f32.mrf.mxu1 }
 0x303   :  { %v734_v30 = vpop.f32.mrf.mxu0 }
 0x304   :  { %v735_v31 = vadd.f32 %v734_v30, %v733_v27  ;;  %v772_v24 = vpop.f32.mrf.mxu1 }
 0x305   :  { %v736_v32 = vpop.f32.mrf.mxu0  ;;  %v773_v34 = vadd.f32 %v772_v24, %v771_v20 }
 0x306   :  { %v543_v33 = vadd.f32 %v735_v31, %v698_v29  ;;  %v774_v35 = vpop.f32.mrf.mxu1 }
 0x307   :  { %v737_v36 = vpop.f32.mrf.mxu0 }
 0x308   :  { %v618_v37 = vadd.f32 %v773_v34, %v543_v33  ;;  %v738_v38 = vadd.f32 %v737_v36, %v736_v32  ;;  %v775_v39 = vpop.f32.mrf.mxu1 }
 0x309   :  { %v776_v41 = vadd.f32 %v775_v39, %v774_v35 }
 0x30a   :  { %v548_v40 = vadd.f32 %v738_v38, %v698_v29  ;;  %v626_v42 = vadd.f32 %v618_v37, %v1001_v25 }
 0x30c   :  { %v623_v43 = vadd.f32 %v776_v41, %v548_v40  ;;  %630 = vadd.xlane.f32.xlu0 %v626_v42 }
 0x30e   :  { %v627_v44 = vadd.f32 %v623_v43, %v1006_v28 }
 0x310   :  { %632 = vadd.xlane.f32.xlu1 %v627_v44 }
 0x395   :  { %v631_v45 = vpop.xlane.xlu0 %630 }
 0x396   :  { %v634_v46 = vmul.f32 0.0078125, %v631_v45 }
 0x398   :  { %v636_v47 = vsub.f32 %v626_v42, %v634_v46 }
 0x399   :  { %v633_v48 = vpop.xlane.xlu1 %632 }
 0x39a   :  { %v635_v49 = vmul.f32 0.0078125, %v633_v48  ;;  %v638_v50 = vmul.f32 %v636_v47, %v636_v47 }
 0x39c   :  { %v637_v51 = vsub.f32 %v627_v44, %v635_v49  ;;  %640 = vadd.xlane.f32.xlu0 %v638_v50 }
 0x39e   :  { %v639_v52 = vmul.f32 %v637_v51, %v637_v51 }
 0x3a0   :  { %642 = vadd.xlane.f32.xlu1 %v639_v52 }
 0x425   :  { %v641_v53 = vpop.xlane.xlu0 %640 }
 0x426   :  { %v644_v54 = vmul.f32 0.0078125, %v641_v53 }
 0x428   :  { %v646_v55 = vadd.f32 1e-05, %v644_v54 }
 0x429   :  { %v643_v56 = vpop.xlane.xlu1 %642 }
 0x42a   :  { %822 = vrsqrt.f32 %v646_v55  ;;  %v645_v25 = vmul.f32 0.0078125, %v643_v56 }
 0x42c   :  { %v647_v57 = vadd.f32 1e-05, %v645_v25 }
 0x42e   :  { %824 = vrsqrt.f32 %v647_v57 }
 0x437   :  { %v823_v28 = vpop.eup %822 }
 0x438   :  { %v650_v59 = vmul.f32 %v823_v28, %v636_v47 }
 0x43a   :  { %v658_v61 = vmul.f32 %v699_v58, %v650_v59 }
 0x43b   :  { %v825_v62 = vpop.eup %824 }
 0x43c   :  { %v651_v63 = vmul.f32 %v825_v62, %v637_v51  ;;  %v666_v0 = vadd.f32 %v700_v60, %v658_v61 }
 0x43e   :  { %v659_v1 = vmul.f32 %v699_v58, %v651_v63  ;;  %668 = vst [vmem:[#allocation8] sm:$0xff] %v666_v0 }
 0x440   :  { %v667_v2 = vadd.f32 %v700_v60, %v659_v1 }
 0x442   :  { %669 = vst [vmem:[#allocation8 + $0x8] sm:$0xff] %v667_v2 }
 0x443   :  { %897 = shalt.err (!%p894_p5)
}
 0x444   :  { %681 = dma.vmem_to_hbm [thread:$0]  %s676_s13, 256, %s1039_s9, [#allocation4], %s916_s19, %s916_s19, %s917_s20  }
 0x445   :  { %910 = dma.done.wait [#allocation4], 256  }
 0x446   :  { %911 = vsyncadd [#allocation4], 4294967040 }
 0x447   :  { %685 = vsyncpa [#allocation3], 1 }
 0x448   :  { %686 = vsyncpa [#allocation6], 1 }
 0x449   :  { %687 = vsyncpa [#allocation4], 1 }

// kernel: tpu_custom_call.1
= control target key start
LH: loop header
LB: loop body
LE: loop exit
PB: predicated region body
PF: predicated region fallthrough
CT: control target
= control target key end

     0   :  { %14 = vsyncpa [#allocation3], 0  ;;  %s1030_s0 = inlined_call_operand.hbm [shape: f32[16,128], index: 0, kind: input, shape index: {}]   ;;  %s1031_s1 = inlined_call_operand.vmem [shape: f32[1,128], index: 1, kind: input, shape index: {}]   ;;  %s1032_s2 = inlined_call_operand.vmem [shape: f32[1,128], index: 2, kind: input, shape index: {}]   ;;  %s1033_s3 = inlined_call_operand.hbm [shape: f32[128,512], index: 3, kind: input, shape index: {}]   ;;  %s1034_s4 = inlined_call_operand.vmem [shape: f32[1,512], index: 4, kind: input, shape index: {}]   ;;  %s1035_s5 = inlined_call_operand.hbm [shape: f32[512,128], index: 5, kind: input, shape index: {}]   ;;  %s1036_s6 = inlined_call_operand.vmem [shape: f32[1,128], index: 6, kind: input, shape index: {}]   ;;  %s1037_s7 = inlined_call_operand.vmem [shape: f32[1,128], index: 7, kind: input, shape index: {}]   ;;  %s1038_s8 = inlined_call_operand.vmem [shape: f32[1,128], index: 8, kind: input, shape index: {}]   ;;  %s1039_s9 = inlined_call_operand.hbm [shape: f32[16,128], index: 9, kind: output, shape index: {}]  }
   0x1   :  { %15 = vsyncpa [#allocation6], 0 }
   0x2   :  { %16 = vsyncpa [#allocation4], 0  ;;  %s912_s30 = smov [#allocation5]  }
   0x3   :  { %s38_s10 = sshll.u32 %s912_s30, 4  ;;  %s39_s10 = int_to_ptr.vmem [resolvable:$true] %s38_s10 }
   0x4   :  { %s834_s11 = scalar_lea.vmem %s39_s10, 8192  ;;  %p839_p1 = scmp.lt.s32.totalorder %s39_s10, %s39_s10 }
   0x5   :  { %p835_p0 = scmp.ne.s32.totalorder %s39_s10, %s834_s11  ;;  %p840_p2 = scmp.lt.s32.totalorder %s834_s11, %s834_s11 }
   0x7   :  { %p841_p3 = por %p840_p2, %p839_p1 }
   0x9   :  { %p842_p4 = pnand %p841_p3, %p835_p0 }
   0xb   :  { %845 = shalt.err (!%p842_p4)
}
   0xc   :  { %s913_s12 = smov 512   ;;  %s914_s13 = smov 32  }
   0xd   :  { %44 = dma.hbm_to_vmem [thread:$0]  %s1033_s3, 8192, %s39_s10, [#allocation6], %s913_s12, %s913_s12, %s914_s13  }
   0xe   :  { %s915_s16 = smov [#allocation2]  }
   0xf   :  { %s22_s17 = sshll.u32 %s915_s16, 4  ;;  %s23_s17 = int_to_ptr.vmem [resolvable:$true] %s22_s17 }
  0x10   :  { %s854_s18 = scalar_lea.vmem %s23_s17, 256  ;;  %p859_p6 = scmp.lt.s32.totalorder %s23_s17, %s23_s17 }
  0x11   :  { %p855_p5 = scmp.ne.s32.totalorder %s23_s17, %s854_s18  ;;  %p860_p7 = scmp.lt.s32.totalorder %s854_s18, %s854_s18 }
  0x13   :  { %p861_p8 = por %p860_p7, %p859_p6 }
  0x15   :  { %p862_p9 = pnand %p861_p8, %p855_p5 }
  0x17   :  { %865 = shalt.err (!%p862_p9)
}
  0x18   :  { %s916_s19 = smov 128   ;;  %s917_s20 = smov 8  }
  0x19   :  { %28 = dma.hbm_to_vmem [thread:$0]  %s1030_s0, 256, %s23_s17, [#allocation3], %s916_s19, %s916_s19, %s917_s20  }
  0x1a   :  { %s918_s3 = smov [#allocation7]  }
  0x1b   :  { %s52_s23 = sshll.u32 %s918_s3, 4  ;;  %s53_s23 = int_to_ptr.vmem [resolvable:$true] %s52_s23 }
  0x1c   :  { %s874_s24 = scalar_lea.vmem %s53_s23, 8192  ;;  %p879_p11 = scmp.lt.s32.totalorder %s53_s23, %s53_s23 }
  0x1d   :  { %p875_p10 = scmp.ne.s32.totalorder %s53_s23, %s874_s24  ;;  %p880_p12 = scmp.lt.s32.totalorder %s874_s24, %s874_s24 }
  0x1f   :  { %p881_p13 = por %p880_p12, %p879_p11 }
  0x21   :  { %p882_p0 = pnand %p881_p13, %p875_p10 }
  0x23   :  { %885 = shalt.err (!%p882_p0)
}
  0x24   :  { %58 = dma.hbm_to_vmem [thread:$0]  %s1035_s5, 8192, %s53_s23, [#allocation6], %s916_s19, %s916_s19, %s917_s20  }
  0x25   :  { %906 = dma.done.wait [#allocation3], 256  }
  0x26   :  { %907 = vsyncadd [#allocation3], 4294967040 }
  0x27   :  { %908 = dma.done.wait [#allocation6], 16384  }
  0x28   :  { %909 = vsyncadd [#allocation6], 4294950912  ;;  %v74_v0 = vld [vmem:[#allocation2] sm:$0xff]  ;;  %v75_v1 = vld [vmem:[#allocation2 + $0x8] sm:$0xff]  ;;  %s920_s12 = smov [#allocation8]  }
  0x29   :  { %78 = vadd.xlane.f32.xlu0 %v74_v0  ;;  %v178_v2 = vld [vmem:[#allocation5 + $0x1e8] sm:$0xff]  ;;  %v180_v3 = vld [vmem:[#allocation5 + $0x1f8] sm:$0xff]  ;;  %v177_v4 = vld [vmem:[#allocation5 + $0x1e0] sm:$0xff]  ;;  %s675_s13 = sshll.u32 %s920_s12, 4  ;;  %s676_s13 = int_to_ptr.vmem [resolvable:$true] %s675_s13 }
  0x2a   :  { %203 = vmatprep.subr.mxu0 %v178_v2  ;;  %280 = vmatprep.subr.mxu1 %v180_v3  ;;  %v179_v5 = vld [vmem:[#allocation5 + $0x1f0] sm:$0xff]  ;;  %v174_v6 = vld [vmem:[#allocation5 + $0x1c8] sm:$0xff]  ;;  %v176_v7 = vld [vmem:[#allocation5 + $0x1d8] sm:$0xff]  ;;  %s886_s14 = scalar_lea.vmem %s676_s13, 256  ;;  %p891_p2 = scmp.lt.s32.totalorder %s676_s13, %s676_s13 }
  0x2b   :  { %204 = vmatpush1.msra.mxu0 %v177_v4  ;;  %281 = vmatpush1.msra.mxu1 %v179_v5  ;;  %v173_v8 = vld [vmem:[#allocation5 + $0x1c0] sm:$0xff]  ;;  %v175_v9 = vld [vmem:[#allocation5 + $0x1d0] sm:$0xff]  ;;  %v170_v10 = vld [vmem:[#allocation5 + $0x1a8] sm:$0xff]  ;;  %p887_p1 = scmp.ne.s32.totalorder %s676_s13, %s886_s14  ;;  %p892_p3 = scmp.lt.s32.totalorder %s886_s14, %s886_s14 }
  0x2c   :  { %205 = vmatprep.subr.mxu0 %v174_v6  ;;  %282 = vmatprep.subr.mxu1 %v176_v7  ;;  %v172_v11 = vld [vmem:[#allocation5 + $0x1b8] sm:$0xff]  ;;  %v169_v12 = vld [vmem:[#allocation5 + $0x1a0] sm:$0xff]  ;;  %v171_v13 = vld [vmem:[#allocation5 + $0x1b0] sm:$0xff] }
  0x2d   :  { %80 = vadd.xlane.f32.xlu0 %v75_v1  ;;  %206 = vmatpush1.msra.mxu0 %v173_v8  ;;  %v166_v14 = vld [vmem:[#allocation5 + $0x188] sm:$0xff]  ;;  %v168_v15 = vld [vmem:[#allocation5 + $0x198] sm:$0xff]  ;;  %v165_v16 = vld [vmem:[#allocation5 + $0x180] sm:$0xff]  ;;  %p893_p4 = por %p892_p3, %p891_p2 }
  0x2e   :  { %283 = vmatpush1.msra.mxu1 %v175_v9  ;;  %207 = vmatprep.subr.mxu0 %v170_v10  ;;  %v167_v17 = vld [vmem:[#allocation5 + $0x190] sm:$0xff]  ;;  %v162_v26 = vld [vmem:[#allocation5 + $0x168] sm:$0xff]  ;;  %v164_v27 = vld [vmem:[#allocation5 + $0x178] sm:$0xff]  ;;  %v919_v10 = vmov 0.0  }
  0x2f   :  { %284 = vmatprep.subr.mxu1 %v172_v11  ;;  %208 = vmatpush1.msra.mxu0 %v169_v12  ;;  %v161_v28 = vld [vmem:[#allocation5 + $0x160] sm:$0xff]  ;;  %v163_v29 = vld [vmem:[#allocation5 + $0x170] sm:$0xff]  ;;  %v158_v30 = vld [vmem:[#allocation5 + $0x148] sm:$0xff]  ;;  %p894_p5 = pnand %p893_p4, %p887_p1 }
  0x30   :  { %285 = vmatpush1.msra.mxu1 %v171_v13  ;;  %209 = vmatprep.subr.mxu0 %v166_v14  ;;  %v160_v31 = vld [vmem:[#allocation5 + $0x158] sm:$0xff]  ;;  %v157_v32 = vld [vmem:[#allocation5 + $0x140] sm:$0xff]  ;;  %v159_v33 = vld [vmem:[#allocation5 + $0x150] sm:$0xff] }
  0x31   :  { %286 = vmatprep.subr.mxu1 %v168_v15  ;;  %210 = vmatpush1.msra.mxu0 %v165_v16  ;;  %v154_v34 = vld [vmem:[#allocation5 + $0x128] sm:$0xff]  ;;  %v156_v35 = vld [vmem:[#allocation5 + $0x138] sm:$0xff]  ;;  %v153_v36 = vld [vmem:[#allocation5 + $0x120] sm:$0xff] }
  0x32   :  { %287 = vmatpush1.msra.mxu1 %v167_v17  ;;  %211 = vmatprep.subr.mxu0 %v162_v26  ;;  %v155_v37 = vld [vmem:[#allocation5 + $0x130] sm:$0xff]  ;;  %v150_v38 = vld [vmem:[#allocation5 + $0x108] sm:$0xff]  ;;  %v152_v39 = vld [vmem:[#allocation5 + $0x118] sm:$0xff] }
  0x33   :  { %288 = vmatprep.subr.mxu1 %v164_v27  ;;  %212 = vmatpush1.msra.mxu0 %v161_v28  ;;  %v149_v40 = vld [vmem:[#allocation5 + $0x100] sm:$0xff]  ;;  %v151_v41 = vld [vmem:[#allocation5 + $0x110] sm:$0xff]  ;;  %v146_v42 = vld [vmem:[#allocation5 + $0xe8] sm:$0xff] }
  0x34   :  { %289 = vmatpush1.msra.mxu1 %v163_v29  ;;  %213 = vmatprep.subr.mxu0 %v158_v30  ;;  %v148_v43 = vld [vmem:[#allocation5 + $0xf8] sm:$0xff]  ;;  %v145_v44 = vld [vmem:[#allocation5 + $0xe0] sm:$0xff]  ;;  %v147_v45 = vld [vmem:[#allocation5 + $0xf0] sm:$0xff] }
  0x35   :  { %290 = vmatprep.subr.mxu1 %v160_v31  ;;  %214 = vmatpush1.msra.mxu0 %v157_v32  ;;  %v142_v46 = vld [vmem:[#allocation5 + $0xc8] sm:$0xff]  ;;  %v144_v47 = vld [vmem:[#allocation5 + $0xd8] sm:$0xff]  ;;  %v141_v48 = vld [vmem:[#allocation5 + $0xc0] sm:$0xff] }
  0x36   :  { %291 = vmatpush1.msra.mxu1 %v159_v33  ;;  %215 = vmatprep.subr.mxu0 %v154_v34  ;;  %v143_v49 = vld [vmem:[#allocation5 + $0xd0] sm:$0xff]  ;;  %v138_v50 = vld [vmem:[#allocation5 + $0xa8] sm:$0xff]  ;;  %v140_v51 = vld [vmem:[#allocation5 + $0xb8] sm:$0xff] }
  0x37   :  { %292 = vmatprep.subr.mxu1 %v156_v35  ;;  %216 = vmatpush1.msra.mxu0 %v153_v36  ;;  %v137_v52 = vld [vmem:[#allocation5 + $0xa0] sm:$0xff]  ;;  %v139_v53 = vld [vmem:[#allocation5 + $0xb0] sm:$0xff]  ;;  %v134_v54 = vld [vmem:[#allocation5 + $0x88] sm:$0xff] }
  0x38   :  { %293 = vmatpush1.msra.mxu1 %v155_v37  ;;  %217 = vmatprep.subr.mxu0 %v150_v38  ;;  %v136_v55 = vld [vmem:[#allocation5 + $0x98] sm:$0xff]  ;;  %v133_v56 = vld [vmem:[#allocation5 + $0x80] sm:$0xff]  ;;  %v135_v57 = vld [vmem:[#allocation5 + $0x90] sm:$0xff] }
  0x39   :  { %294 = vmatprep.subr.mxu1 %v152_v39  ;;  %218 = vmatpush1.msra.mxu0 %v149_v40  ;;  %v130_v58 = vld [vmem:[#allocation5 + $0x68] sm:$0xff]  ;;  %v132_v59 = vld [vmem:[#allocation5 + $0x78] sm:$0xff]  ;;  %v129_v60 = vld [vmem:[#allocation5 + $0x60] sm:$0xff] }
  0x3a   :  { %295 = vmatpush1.msra.mxu1 %v151_v41  ;;  %219 = vmatprep.subr.mxu0 %v146_v42  ;;  %v131_v61 = vld [vmem:[#allocation5 + $0x70] sm:$0xff]  ;;  %v126_v62 = vld [vmem:[#allocation5 + $0x48] sm:$0xff]  ;;  %v128_v63 = vld [vmem:[#allocation5 + $0x58] sm:$0xff] }
  0x3b   :  { %296 = vmatprep.subr.mxu1 %v148_v43  ;;  %220 = vmatpush1.msra.mxu0 %v145_v44  ;;  %v122_v2 = vld [vmem:[#allocation5 + $0x28] sm:$0xff]  ;;  %v124_v3 = vld [vmem:[#allocation5 + $0x38] sm:$0xff]  ;;  %v121_v4 = vld [vmem:[#allocation5 + $0x20] sm:$0xff] }
  0x3c   :  { %297 = vmatpush1.msra.mxu1 %v147_v45  ;;  %221 = vmatprep.subr.mxu0 %v142_v46  ;;  %v123_v5 = vld [vmem:[#allocation5 + $0x30] sm:$0xff]  ;;  %v118_v6 = vld [vmem:[#allocation5 + $0x8] sm:$0xff]  ;;  %v120_v7 = vld [vmem:[#allocation5 + $0x18] sm:$0xff] }
  0x3d   :  { %298 = vmatprep.subr.mxu1 %v144_v47  ;;  %222 = vmatpush1.msra.mxu0 %v141_v48  ;;  %v117_v8 = vld [vmem:[#allocation5] sm:$0xff]  ;;  %v119_v9 = vld [vmem:[#allocation5 + $0x10] sm:$0xff]  ;;  %v468_v29 = vld [vmem:[#allocation7 + $0x1f8] sm:$0xff] }
  0x3e   :  { %299 = vmatpush1.msra.mxu1 %v143_v49  ;;  %223 = vmatprep.subr.mxu0 %v138_v50  ;;  %v420_v30 = vld [vmem:[#allocation7 + $0x78] sm:$0xff]  ;;  %v467_v32 = vld [vmem:[#allocation7 + $0x1f0] sm:$0xff]  ;;  %v434_v35 = vld [vmem:[#allocation7 + $0xe8] sm:$0xff] }
  0x3f   :  { %300 = vmatprep.subr.mxu1 %v140_v51  ;;  %224 = vmatpush1.msra.mxu0 %v137_v52  ;;  %v452_v31 = vld [vmem:[#allocation7 + $0x178] sm:$0xff]  ;;  %v419_v33 = vld [vmem:[#allocation7 + $0x70] sm:$0xff]  ;;  %v466_v36 = vld [vmem:[#allocation7 + $0x1e8] sm:$0xff] }
  0x40   :  { %301 = vmatpush1.msra.mxu1 %v139_v53  ;;  %225 = vmatprep.subr.mxu0 %v134_v54  ;;  %v451_v34 = vld [vmem:[#allocation7 + $0x170] sm:$0xff]  ;;  %v418_v37 = vld [vmem:[#allocation7 + $0x68] sm:$0xff]  ;;  %v433_v39 = vld [vmem:[#allocation7 + $0xe0] sm:$0xff] }
  0x41   :  { %302 = vmatprep.subr.mxu1 %v136_v55  ;;  %226 = vmatpush1.msra.mxu0 %v133_v56  ;;  %v450_v38 = vld [vmem:[#allocation7 + $0x168] sm:$0xff]  ;;  %v465_v40 = vld [vmem:[#allocation7 + $0x1e0] sm:$0xff]  ;;  %v432_v43 = vld [vmem:[#allocation7 + $0xd8] sm:$0xff] }
  0x42   :  { %303 = vmatpush1.msra.mxu1 %v135_v57  ;;  %227 = vmatprep.subr.mxu0 %v130_v58  ;;  %v417_v41 = vld [vmem:[#allocation7 + $0x60] sm:$0xff]  ;;  %v464_v44 = vld [vmem:[#allocation7 + $0x1d8] sm:$0xff]  ;;  %v431_v47 = vld [vmem:[#allocation7 + $0xd0] sm:$0xff] }
  0x43   :  { %304 = vmatprep.subr.mxu1 %v132_v59  ;;  %228 = vmatpush1.msra.mxu0 %v129_v60  ;;  %v449_v42 = vld [vmem:[#allocation7 + $0x160] sm:$0xff]  ;;  %v416_v45 = vld [vmem:[#allocation7 + $0x58] sm:$0xff]  ;;  %v463_v48 = vld [vmem:[#allocation7 + $0x1d0] sm:$0xff] }
  0x44   :  { %305 = vmatpush1.msra.mxu1 %v131_v61  ;;  %229 = vmatprep.subr.mxu0 %v126_v62  ;;  %v448_v46 = vld [vmem:[#allocation7 + $0x158] sm:$0xff]  ;;  %v415_v49 = vld [vmem:[#allocation7 + $0x50] sm:$0xff]  ;;  %v430_v51 = vld [vmem:[#allocation7 + $0xc8] sm:$0xff] }
  0x45   :  { %306 = vmatprep.subr.mxu1 %v128_v63  ;;  %267 = vmatprep.mubr.f32.mxu0 %v919_v10  ;;  %v447_v50 = vld [vmem:[#allocation7 + $0x150] sm:$0xff]  ;;  %v462_v52 = vld [vmem:[#allocation7 + $0x1c8] sm:$0xff]  ;;  %v429_v55 = vld [vmem:[#allocation7 + $0xc0] sm:$0xff] }
  0x46   :  { %344 = vmatprep.mubr.f32.mxu1 %v919_v10  ;;  %v414_v53 = vld [vmem:[#allocation7 + $0x48] sm:$0xff]  ;;  %v461_v56 = vld [vmem:[#allocation7 + $0x1c0] sm:$0xff]  ;;  %v428_v59 = vld [vmem:[#allocation7 + $0xb8] sm:$0xff] }
  0x47   :  { %v446_v54 = vld [vmem:[#allocation7 + $0x148] sm:$0xff]  ;;  %v413_v57 = vld [vmem:[#allocation7 + $0x40] sm:$0xff]  ;;  %v460_v60 = vld [vmem:[#allocation7 + $0x1b8] sm:$0xff] }
  0x48   :  { %v445_v58 = vld [vmem:[#allocation7 + $0x140] sm:$0xff]  ;;  %v412_v61 = vld [vmem:[#allocation7 + $0x38] sm:$0xff]  ;;  %v427_v63 = vld [vmem:[#allocation7 + $0xb0] sm:$0xff] }
  0x49   :  { %v444_v62 = vld [vmem:[#allocation7 + $0x138] sm:$0xff] }
  0xb2   :  { %v79_v18 = vpop.xlane.xlu0 %78 }
  0xb3   :  { %v83_v19 = vmul.f32 0.0078125, %v79_v18  ;;  %v688_v18 = vld [vmem:[%s1031_s1] ss:$0 sm:$0xff] }
  0xb5   :  { %v986_v20 = vsub.f32 %v74_v0, %v83_v19  ;;  %v125_v0 = vld [vmem:[#allocation5 + $0x40] sm:$0xff] }
  0xb6   :  { %v81_v21 = vpop.xlane.xlu0 %80  ;;  %230 = vmatpush1.msra.mxu0 %v125_v0  ;;  %v459_v0 = vld [vmem:[#allocation7 + $0x1b0] sm:$0xff] }
  0xb7   :  { %v84_v22 = vmul.f32 0.0078125, %v81_v21  ;;  %v87_v23 = vmul.f32 %v986_v20, %v986_v20  ;;  %231 = vmatprep.subr.mxu0 %v122_v2  ;;  %v689_v21 = vld [vmem:[%s1032_s2] ss:$0 sm:$0xff] }
  0xb8   :  { %232 = vmatpush1.msra.mxu0 %v121_v4  ;;  %v443_v2 = vld [vmem:[#allocation7 + $0x130] sm:$0xff]  ;;  %v458_v4 = vld [vmem:[#allocation7 + $0x1a8] sm:$0xff] }
  0xb9   :  { %v990_v24 = vsub.f32 %v75_v1, %v84_v22  ;;  %89 = vadd.xlane.f32.xlu1 %v87_v23  ;;  %v127_v1 = vld [vmem:[#allocation5 + $0x50] sm:$0xff]  ;;  %233 = vmatprep.subr.mxu0 %v118_v6  ;;  %v442_v6 = vld [vmem:[#allocation7 + $0x128] sm:$0xff] }
  0xba   :  { %307 = vmatpush1.msra.mxu1 %v127_v1  ;;  %234 = vmatpush1.msra.mxu0 %v117_v8  ;;  %v411_v1 = vld [vmem:[#allocation7 + $0x30] sm:$0xff]  ;;  %v457_v8 = vld [vmem:[#allocation7 + $0x1a0] sm:$0xff] }
  0xbb   :  { %v88_v25 = vmul.f32 %v990_v24, %v990_v24  ;;  %308 = vmatprep.subr.mxu1 %v124_v3  ;;  %v426_v3 = vld [vmem:[#allocation7 + $0xa8] sm:$0xff] }
  0xbc   :  { %309 = vmatpush1.msra.mxu1 %v123_v5  ;;  %v410_v5 = vld [vmem:[#allocation7 + $0x28] sm:$0xff] }
  0xbd   :  { %91 = vadd.xlane.f32.xlu1 %v88_v25  ;;  %310 = vmatprep.subr.mxu1 %v120_v7  ;;  %v425_v7 = vld [vmem:[#allocation7 + $0xa0] sm:$0xff] }
  0xbe   :  { %311 = vmatpush1.msra.mxu1 %v119_v9  ;;  %v409_v9 = vld [vmem:[#allocation7 + $0x20] sm:$0xff] }
  0xbf   :  { %739 = vmatprep.subr.mxu1 %v468_v29  ;;  %v437_v29 = vld [vmem:[#allocation7 + $0x100] sm:$0xff] }
 0x142   :  { %v90_v11 = vpop.xlane.xlu1 %89 }
 0x143   :  { %v93_v12 = vmul.f32 0.0078125, %v90_v11  ;;  %v424_v11 = vld [vmem:[#allocation7 + $0x98] sm:$0xff] }
 0x145   :  { %v95_v13 = vadd.f32 1e-05, %v93_v12  ;;  %v456_v12 = vld [vmem:[#allocation7 + $0x198] sm:$0xff] }
 0x146   :  { %v92_v14 = vpop.xlane.xlu1 %91 }
 0x147   :  { %786 = vrsqrt.f32 %v95_v13  ;;  %v94_v15 = vmul.f32 0.0078125, %v92_v14  ;;  %v408_v13 = vld [vmem:[#allocation7 + $0x18] sm:$0xff] }
 0x148   :  { %v440_v14 = vld [vmem:[#allocation7 + $0x118] sm:$0xff] }
 0x149   :  { %v96_v16 = vadd.f32 1e-05, %v94_v15  ;;  %v423_v15 = vld [vmem:[#allocation7 + $0x90] sm:$0xff] }
 0x14b   :  { %788 = vrsqrt.f32 %v96_v16  ;;  %v455_v16 = vld [vmem:[#allocation7 + $0x190] sm:$0xff] }
 0x154   :  { %v787_v17 = vpop.eup %786 }
 0x155   :  { %v99_v19 = vmul.f32 %v787_v17, %v986_v20  ;;  %v436_v20 = vld [vmem:[#allocation7 + $0xf8] sm:$0xff]  ;;  %v407_v17 = vld [vmem:[#allocation7 + $0x10] sm:$0xff] }
 0x156   :  { %701 = vmatprep.subr.mxu0 %v436_v20  ;;  %v405_v20 = vld [vmem:[#allocation7] sm:$0xff] }
 0x157   :  { %v107_v22 = vmul.f32 %v688_v18, %v99_v19  ;;  %v422_v19 = vld [vmem:[#allocation7 + $0x88] sm:$0xff] }
 0x158   :  { %v789_v23 = vpop.eup %788 }
 0x159   :  { %v1001_v25 = vadd.f32 %v689_v21, %v107_v22  ;;  %v100_v26 = vmul.f32 %v789_v23, %v990_v24  ;;  %v435_v24 = vld [vmem:[#allocation7 + $0xf0] sm:$0xff]  ;;  %v406_v22 = vld [vmem:[#allocation7 + $0x8] sm:$0xff] }
 0x15a   :  { %v438_v23 = vld [vmem:[#allocation7 + $0x108] sm:$0xff] }
 0x15b   :  { %268 = vmatmul.mubr.f32.vlgmr.msra.gmra.mxu0 %v1001_v25  ;;  %345 = vmatmul.mubr.f32.vlgmr.msra.gmra.mxu1 %v1001_v25  ;;  %v108_v27 = vmul.f32 %v688_v18, %v100_v26  ;;  %v439_v18 = vld [vmem:[#allocation7 + $0x110] sm:$0xff]  ;;  %v421_v26 = vld [vmem:[#allocation7 + $0x80] sm:$0xff] }
 0x15c   :  { %273 = vmatprep.mubr.f32.mxu0 %v919_v10  ;;  %350 = vmatprep.mubr.f32.mxu1 %v919_v10  ;;  %v441_v10 = vld [vmem:[#allocation7 + $0x120] sm:$0xff] }
 0x15d   :  { %v1006_v28 = vadd.f32 %v689_v21, %v108_v27  ;;  %702 = vmatpush3.msra.mxu0 %v420_v30  ;;  %740 = vmatpush3.msra.mxu1 %v452_v31  ;;  %v454_v21 = vld [vmem:[#allocation7 + $0x188] sm:$0xff]  ;;  %v453_v27 = vld [vmem:[#allocation7 + $0x180] sm:$0xff]  ;;  %v183_v30 = vlaneseq }
 0x15e   :  { %703 = vmatprep.subr.mxu0 %v435_v24  ;;  %741 = vmatprep.subr.mxu1 %v467_v32 }
 0x15f   :  { %274 = vmatmul.mubr.f32.gmra.mxu0 %v1006_v28  ;;  %351 = vmatmul.mubr.f32.gmra.mxu1 %v1006_v28  ;;  %v184_v31 = vshrl.u32 %v183_v30, 7 }
 0x160   :  { %704 = vmatpush3.msra.mxu0 %v419_v33  ;;  %742 = vmatpush3.msra.mxu1 %v451_v34  ;;  %v181_v33 = vld [vmem:[%s1034_s4] sm:$0xf] }
 0x161   :  { %705 = vmatprep.subr.mxu0 %v434_v35  ;;  %743 = vmatprep.subr.mxu1 %v466_v36  ;;  %v185_v24 = vsub.s32 0, %v184_v31  ;;  %v193_v32 = vsub.s32 2, %v184_v31  ;;  %v189_v34 = vsub.s32 1, %v184_v31  ;;  %v197_v35 = vsub.s32 3, %v184_v31 }
 0x162   :  { %706 = vmatpush3.msra.mxu0 %v418_v37  ;;  %744 = vmatpush3.msra.mxu1 %v450_v38 }
 0x163   :  { %707 = vmatprep.subr.mxu0 %v433_v39  ;;  %745 = vmatprep.subr.mxu1 %v465_v40  ;;  %v186_v36 = vrot.slane %v181_v33, %v185_v24  ;;  %v194_v37 = vrot.slane %v181_v33, %v193_v32  ;;  %v190_v38 = vrot.slane %v181_v33, %v189_v34 }
 0x164   :  { %708 = vmatpush3.msra.mxu0 %v417_v41  ;;  %746 = vmatpush3.msra.mxu1 %v449_v42  ;;  %v198_v39 = vrot.slane %v181_v33, %v197_v35 }
 0x165   :  { %709 = vmatprep.subr.mxu0 %v432_v43  ;;  %747 = vmatprep.subr.mxu1 %v464_v44 }
 0x166   :  { %710 = vmatpush3.msra.mxu0 %v416_v45  ;;  %748 = vmatpush3.msra.mxu1 %v448_v46 }
 0x167   :  { %711 = vmatprep.subr.mxu0 %v431_v47  ;;  %749 = vmatprep.subr.mxu1 %v463_v48 }
 0x168   :  { %712 = vmatpush3.msra.mxu0 %v415_v49  ;;  %750 = vmatpush3.msra.mxu1 %v447_v50 }
 0x169   :  { %713 = vmatprep.subr.mxu0 %v430_v51  ;;  %751 = vmatprep.subr.mxu1 %v462_v52 }
 0x16a   :  { %714 = vmatpush3.msra.mxu0 %v414_v53  ;;  %752 = vmatpush3.msra.mxu1 %v446_v54 }
 0x16b   :  { %715 = vmatprep.subr.mxu0 %v429_v55  ;;  %753 = vmatprep.subr.mxu1 %v461_v56 }
 0x16c   :  { %716 = vmatpush3.msra.mxu0 %v413_v57  ;;  %754 = vmatpush3.msra.mxu1 %v445_v58 }
 0x16d   :  { %717 = vmatprep.subr.mxu0 %v428_v59  ;;  %755 = vmatprep.subr.mxu1 %v460_v60 }
 0x16e   :  { %718 = vmatpush3.msra.mxu0 %v412_v61  ;;  %756 = vmatpush3.msra.mxu1 %v444_v62 }
 0x16f   :  { %719 = vmatprep.subr.mxu0 %v427_v63  ;;  %757 = vmatprep.subr.mxu1 %v459_v0 }
 0x170   :  { %720 = vmatpush3.msra.mxu0 %v411_v1  ;;  %758 = vmatpush3.msra.mxu1 %v443_v2 }
 0x171   :  { %721 = vmatprep.subr.mxu0 %v426_v3  ;;  %759 = vmatprep.subr.mxu1 %v458_v4 }
 0x172   :  { %722 = vmatpush3.msra.mxu0 %v410_v5  ;;  %760 = vmatpush3.msra.mxu1 %v442_v6 }
 0x173   :  { %723 = vmatprep.subr.mxu0 %v425_v7  ;;  %761 = vmatprep.subr.mxu1 %v457_v8 }
 0x174   :  { %724 = vmatpush3.msra.mxu0 %v409_v9  ;;  %762 = vmatpush3.msra.mxu1 %v441_v10 }
 0x175   :  { %725 = vmatprep.subr.mxu0 %v424_v11  ;;  %763 = vmatprep.subr.mxu1 %v456_v12 }
 0x176   :  { %726 = vmatpush3.msra.mxu0 %v408_v13  ;;  %764 = vmatpush3.msra.mxu1 %v440_v14 }
 0x177   :  { %727 = vmatprep.subr.mxu0 %v423_v15  ;;  %765 = vmatprep.subr.mxu1 %v455_v16 }
 0x178   :  { %728 = vmatpush3.msra.mxu0 %v407_v17  ;;  %766 = vmatpush3.msra.mxu1 %v439_v18 }
 0x179   :  { %729 = vmatprep.subr.mxu0 %v422_v19  ;;  %767 = vmatprep.subr.mxu1 %v454_v21 }
 0x17a   :  { %730 = vmatpush3.msra.mxu0 %v406_v22  ;;  %768 = vmatpush3.msra.mxu1 %v438_v23 }
 0x17b   :  { %731 = vmatprep.subr.mxu0 %v421_v26  ;;  %769 = vmatprep.subr.mxu1 %v453_v27 }
 0x17c   :  { %732 = vmatpush3.msra.mxu0 %v405_v20  ;;  %770 = vmatpush3.msra.mxu1 %v437_v29  ;;  %v698_v29 = vld [vmem:[%s1036_s6] ss:$0 sm:$0xff] }
 0x21b   :  { %v269_v40 = vpop.f32.mrf.mxu0  ;;  %v346_v41 = vpop.f32.mrf.mxu1 }
 0x21c   :  { %v270_v42 = vadd.f32 %v269_v40, %v186_v36  ;;  %v347_v43 = vadd.f32 %v346_v41, %v194_v37 }
 0x21d   :  { %v271_v44 = vpop.f32.mrf.mxu0  ;;  %v348_v45 = vpop.f32.mrf.mxu1 }
 0x21e   :  { %v690_v46 = vmul.f32 -1.442695, %v270_v42  ;;  %v692_v47 = vmul.f32 -1.442695, %v347_v43  ;;  %v272_v48 = vadd.f32 %v271_v44, %v190_v38  ;;  %v349_v49 = vadd.f32 %v348_v45, %v198_v39 }
 0x21f   :  { %v275_v50 = vpop.f32.mrf.mxu0  ;;  %v352_v51 = vpop.f32.mrf.mxu1 }
 0x220   :  { %790 = vpow2.f32 %v690_v46  ;;  %v691_v52 = vmul.f32 -1.442695, %v272_v48  ;;  %v693_v53 = vmul.f32 -1.442695, %v349_v49  ;;  %v276_v54 = vadd.f32 %v275_v50, %v186_v36 }
 0x221   :  { %792 = vpow2.f32 %v692_v47  ;;  %v353_v55 = vadd.f32 %v352_v51, %v194_v37  ;;  %v277_v56 = vpop.f32.mrf.mxu0  ;;  %v354_v57 = vpop.f32.mrf.mxu1 }
 0x222   :  { %794 = vpow2.f32 %v691_v52  ;;  %v694_v58 = vmul.f32 -1.442695, %v276_v54  ;;  %v278_v59 = vadd.f32 %v277_v56, %v190_v38  ;;  %v355_v60 = vadd.f32 %v354_v57, %v198_v39 }
 0x223   :  { %796 = vpow2.f32 %v693_v53  ;;  %v696_v61 = vmul.f32 -1.442695, %v353_v55 }
 0x224   :  { %798 = vpow2.f32 %v694_v58  ;;  %v695_v62 = vmul.f32 -1.442695, %v278_v59  ;;  %v697_v63 = vmul.f32 -1.442695, %v355_v60  ;;  %v699_v58 = vld [vmem:[%s1037_s7] ss:$0 sm:$0xff] }
 0x225   :  { %800 = vpow2.f32 %v696_v61  ;;  %v700_v60 = vld [vmem:[%s1038_s8] ss:$0 sm:$0xff] }
 0x226   :  { %802 = vpow2.f32 %v695_v62 }
 0x227   :  { %804 = vpow2.f32 %v697_v63 }
 0x22d   :  { %v791_v0 = vpop.eup %790 }
 0x22e   :  { %v793_v1 = vpop.eup %792  ;;  %v381_v2 = vadd.f32 1.0, %v791_v0 }
 0x22f   :  { %v795_v3 = vpop.eup %794  ;;  %v383_v5 = vadd.f32 1.0, %v793_v1 }
 0x230   :  { %v797_v4 = vpop.eup %796  ;;  %v382_v6 = vadd.f32 1.0, %v795_v3  ;;  %806 = vrcp.f32 %v381_v2 }
 0x231   :  { %v799_v7 = vpop.eup %798  ;;  %v384_v8 = vadd.f32 1.0, %v797_v4 }
 0x232   :  { %v801_v9 = vpop.eup %800  ;;  %808 = vrcp.f32 %v382_v6  ;;  %v385_v10 = vadd.f32 1.0, %v799_v7 }
 0x233   :  { %v803_v11 = vpop.eup %802  ;;  %810 = vrcp.f32 %v384_v8  ;;  %v387_v13 = vadd.f32 1.0, %v801_v9 }
 0x234   :  { %v805_v12 = vpop.eup %804  ;;  %812 = vrcp.f32 %v383_v5  ;;  %v386_v14 = vadd.f32 1.0, %v803_v11 }
 0x235   :  { %814 = vrcp.f32 %v385_v10  ;;  %v388_v15 = vadd.f32 1.0, %v805_v12 }
 0x236   :  { %816 = vrcp.f32 %v386_v14 }
 0x237   :  { %818 = vrcp.f32 %v388_v15 }
 0x238   :  { %820 = vrcp.f32 %v387_v13 }
 0x23d   :  { %v807_v16 = vpop.eup %806 }
 0x23f   :  { %v809_v17 = vpop.eup %808 }
 0x240   :  { %v811_v18 = vpop.eup %810  ;;  %540 = vmatprep.mubr.f32.mxu0 %v809_v17 }
 0x241   :  { %v813_v19 = vpop.eup %812  ;;  %615 = vmatprep.mubr.f32.mxu1 %v811_v18  ;;  %541 = vmatmul.mubr.f32.vlgmr.msra.gmra.mxu0 %v807_v16 }
 0x242   :  { %v815_v21 = vpop.eup %814  ;;  %616 = vmatmul.mubr.f32.vlgmr.msra.gmra.mxu1 %v813_v19 }
 0x243   :  { %v817_v22 = vpop.eup %816 }
 0x244   :  { %v819_v23 = vpop.eup %818  ;;  %545 = vmatprep.mubr.f32.mxu0 %v817_v22 }
 0x245   :  { %v821_v26 = vpop.eup %820  ;;  %620 = vmatprep.mubr.f32.mxu1 %v819_v23  ;;  %546 = vmatmul.mubr.f32.gmra.mxu0 %v815_v21 }
 0x246   :  { %621 = vmatmul.mubr.f32.gmra.mxu1 %v821_v26 }
 0x301   :  { %v733_v27 = vpop.f32.mrf.mxu0 }
 0x302   :  { %v771_v20 = vpop.f32.mrf.mxu1 }
 0x303   :  { %v734_v30 = vpop.f32.mrf.mxu0 }
 0x304   :  { %v735_v31 = vadd.f32 %v734_v30, %v733_v27  ;;  %v772_v24 = vpop.f32.mrf.mxu1 }
 0x305   :  { %v736_v32 = vpop.f32.mrf.mxu0  ;;  %v773_v34 = vadd.f32 %v772_v24, %v771_v20 }
 0x306   :  { %v543_v33 = vadd.f32 %v735_v31, %v698_v29  ;;  %v774_v35 = vpop.f32.mrf.mxu1 }
 0x307   :  { %v737_v36 = vpop.f32.mrf.mxu0 }
 0x308   :  { %v618_v37 = vadd.f32 %v773_v34, %v543_v33  ;;  %v738_v38 = vadd.f32 %v737_v36, %v736_v32  ;;  %v775_v39 = vpop.f32.mrf.mxu1 }
 0x309   :  { %v776_v41 = vadd.f32 %v775_v39, %v774_v35 }
 0x30a   :  { %v548_v40 = vadd.f32 %v738_v38, %v698_v29  ;;  %v626_v42 = vadd.f32 %v618_v37, %v1001_v25 }
 0x30c   :  { %v623_v43 = vadd.f32 %v776_v41, %v548_v40  ;;  %630 = vadd.xlane.f32.xlu0 %v626_v42 }
 0x30e   :  { %v627_v44 = vadd.f32 %v623_v43, %v1006_v28 }
 0x310   :  { %632 = vadd.xlane.f32.xlu1 %v627_v44 }
 0x395   :  { %v631_v45 = vpop.xlane.xlu0 %630 }
 0x396   :  { %v634_v46 = vmul.f32 0.0078125, %v631_v45 }
 0x398   :  { %v636_v47 = vsub.f32 %v626_v42, %v634_v46 }
 0x399   :  { %v633_v48 = vpop.xlane.xlu1 %632 }
 0x39a   :  { %v635_v49 = vmul.f32 0.0078125, %v633_v48  ;;  %v638_v50 = vmul.f32 %v636_v47, %v636_v47 }
 0x39c   :  { %v637_v51 = vsub.f32 %v627_v44, %v635_v49  ;;  %640 = vadd.xlane.f32.xlu0 %v638_v50 }
 0x39e   :  { %v639_v52 = vmul.f32 %v637_v51, %v637_v51 }
 0x3a0   :  { %642 = vadd.xlane.f32.xlu1 %v639_v52 }
 0x425   :  { %v641_v53 = vpop.xlane.xlu0 %640 }
 0x426   :  { %v644_v54 = vmul.f32 0.0078125, %v641_v53 }
 0x428   :  { %v646_v55 = vadd.f32 1e-05, %v644_v54 }
 0x429   :  { %v643_v56 = vpop.xlane.xlu1 %642 }
 0x42a   :  { %822 = vrsqrt.f32 %v646_v55  ;;  %v645_v25 = vmul.f32 0.0078125, %v643_v56 }
 0x42c   :  { %v647_v57 = vadd.f32 1e-05, %v645_v25 }
 0x42e   :  { %824 = vrsqrt.f32 %v647_v57 }
 0x437   :  { %v823_v28 = vpop.eup %822 }
 0x438   :  { %v650_v59 = vmul.f32 %v823_v28, %v636_v47 }
 0x43a   :  { %v658_v61 = vmul.f32 %v699_v58, %v650_v59 }
 0x43b   :  { %v825_v62 = vpop.eup %824 }
 0x43c   :  { %v651_v63 = vmul.f32 %v825_v62, %v637_v51  ;;  %v666_v0 = vadd.f32 %v700_v60, %v658_v61 }
 0x43e   :  { %v659_v1 = vmul.f32 %v699_v58, %v651_v63  ;;  %668 = vst [vmem:[#allocation8] sm:$0xff] %v666_v0 }
 0x440   :  { %v667_v2 = vadd.f32 %v700_v60, %v659_v1 }
 0x442   :  { %669 = vst [vmem:[#allocation8 + $0x8] sm:$0xff] %v667_v2 }
 0x443   :  { %897 = shalt.err (!%p894_p5)
}
 0x444   :  { %681 = dma.vmem_to_hbm [thread:$0]  %s676_s13, 256, %s1039_s9, [#allocation4], %s916_s19, %s916_s19, %s917_s20  }
 0x445   :  { %910 = dma.done.wait [#allocation4], 256  }
 0x446   :  { %911 = vsyncadd [#allocation4], 4294967040 }
 0x447   :  { %685 = vsyncpa [#allocation3], 1 }
 0x448   :  { %686 = vsyncpa [#allocation6], 1 }
 0x449   :  { %687 = vsyncpa [#allocation4], 1 }

</bundles_post_ra>
